<compile_context>
chip_gen: v7x
topology: tpu7x:2x2x1
jax: 0.10.0
libtpu: 0.0.40
codegen_flags: <defaults>
</compile_context>

<pallas_src>
import math
import functools

import jax
import jax.numpy as jnp
from jax.experimental import pallas as pl
from jax.experimental.pallas import tpu as pltpu


# ----------------------------------------------------------------------------
# Fused kernel: all encoder layers + vocab projection for one batch element.
# ----------------------------------------------------------------------------
def fused_encoder_kernel(x_ref,
                         wq_ref, wk_ref, wv_ref, bq_ref, bk_ref, bv_ref,
                         wo_ref, bo_ref,
                         w1_ref, b1_ref, w2_ref, b2_ref,
                         g1_ref, be1_ref, g2_ref, be2_ref,
                         wout_ref, bout_ref,
                         logits_ref, x_sc, *, heads, eps=1e-5):
    layer = pl.program_id(1)

    # Load the embedded input into the VMEM-resident activation at layer 0.
    @pl.when(layer == 0)
    def _():
        x_sc[...] = x_ref[...]

    x = x_sc[...]                                       # (L, D) float32
    L, D = x.shape

    # ---- multi-head self attention (head-batched einsums) -------------------
    xb = jnp.broadcast_to(x.astype(jnp.bfloat16), (heads, L, D))

    # Weights are pre-split per head in the wrapper: (H, D, hd).
    # 1/sqrt(head_dim) is already folded into wq/bq.
    q = jnp.einsum('hld,hdf->hlf', xb, wq_ref[...],
                   preferred_element_type=jnp.float32) + bq_ref[...]
    k = jnp.einsum('hld,hdf->hlf', xb, wk_ref[...],
                   preferred_element_type=jnp.float32) + bk_ref[...]
    v = jnp.einsum('hld,hdf->hlf', xb, wv_ref[...],
                   preferred_element_type=jnp.float32) + bv_ref[...]

    s = jnp.einsum('hqd,hkd->hqk', q.astype(jnp.bfloat16), k.astype(jnp.bfloat16),
                   preferred_element_type=jnp.float32)          # (H, L, L)
    s = s - jnp.max(s, axis=-1, keepdims=True)
    p = jnp.exp(s)
    p = p * pl.reciprocal(jnp.sum(p, axis=-1, keepdims=True), approx=True)

    ctx = jnp.einsum('hqk,hkd->hqd', p.astype(jnp.bfloat16), v.astype(jnp.bfloat16),
                     preferred_element_type=jnp.float32)        # (H, L, hd)

    # Output projection absorbs the head merge: sum_h ctx_h @ Wo_h == concat @ Wo.
    attn = jnp.einsum('hld,hdf->hlf', ctx.astype(jnp.bfloat16), wo_ref[...],
                      preferred_element_type=jnp.float32).sum(axis=0) + bo_ref[...]

    def layer_norm(y, g, b):
        mu = jnp.mean(y, axis=-1, keepdims=True)
        var = jnp.mean((y - mu) * (y - mu), axis=-1, keepdims=True)
        return (y - mu) * jax.lax.rsqrt(var + eps) * g + b

    # Post-norm: norm1(x + attn(x))   (dropout == identity in eval mode)
    x1 = layer_norm(x + attn, g1_ref[...], be1_ref[...])

    # ---- feed-forward --------------------------------------------------------
    h1 = jnp.dot(x1.astype(jnp.bfloat16), w1_ref[...],
                 preferred_element_type=jnp.float32) + b1_ref[...]
    h1 = jnp.maximum(h1, 0.0)
    ffn = jnp.dot(h1.astype(jnp.bfloat16), w2_ref[...],
                  preferred_element_type=jnp.float32) + b2_ref[...]

    x2 = layer_norm(x1 + ffn, g2_ref[...], be2_ref[...])
    x_sc[...] = x2                                      # carry to next layer

    # ---- vocab projection, only after the last layer (lane-dense output) ----
    @pl.when(layer == pl.num_programs(1) - 1)
    def _():
        logits_ref[...] = jnp.dot(x2.astype(jnp.bfloat16), wout_ref[...],
                                  preferred_element_type=jnp.float32) + bout_ref[...]


# ----------------------------------------------------------------------------
# Wrapper
# ----------------------------------------------------------------------------
def transformer_encoder_forward(tokens, params, pe, heads, vocab_size):
    # Glue: embedding gather + positional encoding (plain JAX).
    B, L = tokens.shape
    x = params["embed"][tokens] + pe[None, :L, :]       # (B, L, D) float32
    D = x.shape[-1]
    H = heads
    hd = D // H
    NL = params["wq_h"].shape[0]
    Hff = params["w1"].shape[-1]
    Vp = params["w_out"].shape[-1]                      # padded (lane-dense) vocab

    logits_padded = pl.pallas_call(
        functools.partial(fused_encoder_kernel, heads=H),
        out_shape=jax.ShapeDtypeStruct((B, L, Vp), jnp.float32),
        grid=(B, NL),
        in_specs=[
            pl.BlockSpec((None, L, D), lambda b, l: (b, 0, 0)),            # x
            pl.BlockSpec((None, H, D, hd), lambda b, l: (l, 0, 0, 0)),     # wq
            pl.BlockSpec((None, H, D, hd), lambda b, l: (l, 0, 0, 0)),     # wk
            pl.BlockSpec((None, H, D, hd), lambda b, l: (l, 0, 0, 0)),     # wv
            pl.BlockSpec((None, H, 1, hd), lambda b, l: (l, 0, 0, 0)),     # bq
            pl.BlockSpec((None, H, 1, hd), lambda b, l: (l, 0, 0, 0)),     # bk
            pl.BlockSpec((None, H, 1, hd), lambda b, l: (l, 0, 0, 0)),     # bv
            pl.BlockSpec((None, H, hd, D), lambda b, l: (l, 0, 0, 0)),     # wo
            pl.BlockSpec((None, 1, D), lambda b, l: (l, 0, 0)),            # bo
            pl.BlockSpec((None, D, Hff), lambda b, l: (l, 0, 0)),          # w1
            pl.BlockSpec((None, 1, Hff), lambda b, l: (l, 0, 0)),          # b1
            pl.BlockSpec((None, Hff, D), lambda b, l: (l, 0, 0)),          # w2
            pl.BlockSpec((None, 1, D), lambda b, l: (l, 0, 0)),            # b2
            pl.BlockSpec((None, 1, D), lambda b, l: (l, 0, 0)),            # g1
            pl.BlockSpec((None, 1, D), lambda b, l: (l, 0, 0)),            # be1
            pl.BlockSpec((None, 1, D), lambda b, l: (l, 0, 0)),            # g2
            pl.BlockSpec((None, 1, D), lambda b, l: (l, 0, 0)),            # be2
            pl.BlockSpec((D, Vp), lambda b, l: (0, 0)),                    # w_out
            pl.BlockSpec((1, Vp), lambda b, l: (0, 0)),                    # b_out
        ],
        out_specs=pl.BlockSpec((None, L, Vp), lambda b, l: (b, 0, 0)),
        scratch_shapes=[pltpu.VMEM((L, D), jnp.float32)],                  # resident x
        compiler_params=pltpu.CompilerParams(
            dimension_semantics=("parallel", "arbitrary")),
    )(x,
      params["wq_h"], params["wk_h"], params["wv_h"],
      params["bq_h"], params["bk_h"], params["bv_h"],
      params["wo_h"], params["bo"],
      params["w1"], params["b1"], params["w2"], params["b2"],
      params["g1"], params["be1"], params["g2"], params["be2"],
      params["w_out"], params["b_out"])

    return logits_padded[..., :vocab_size]


# ----------------------------------------------------------------------------
# Model setup (deterministic synthetic parameters)
# ----------------------------------------------------------------------------
def make_positional_encoding(d_model, max_len):
    pos = jnp.arange(max_len, dtype=jnp.float32)[:, None]
    div = jnp.exp(jnp.arange(0, d_model, 2, dtype=jnp.float32)
                  * (-math.log(10000.0) / d_model))
    pe = jnp.zeros((max_len, d_model), dtype=jnp.float32)
    pe = pe.at[:, 0::2].set(jnp.sin(pos * div))
    pe = pe.at[:, 1::2].set(jnp.cos(pos * div))
    return pe                                           # (max_len, d_model)


def init_params(key, d_model, heads, layers, hidden_dim, vocab_size):
    hd = d_model // heads
    keys = jax.random.split(key, 2 + 6 * layers)        # fixed count: no iterator bugs

    def lin(k, fan_in, fan_out, scale=0.05):
        return scale * jax.random.normal(k, (fan_in, fan_out), jnp.float32)

    embed = jax.random.normal(keys[0], (vocab_size, d_model), jnp.float32)

    # Vocab projection padded to a 128-multiple last dim (lane-dense output).
    v_pad = ((vocab_size + 127) // 128) * 128
    w_out = lin(keys[1], d_model, vocab_size)
    w_out_p = jnp.zeros((d_model, v_pad), jnp.float32).at[:, :vocab_size].set(w_out)
    b_out_p = jnp.zeros((1, v_pad), jnp.float32)

    inv_scale = 1.0 / math.sqrt(hd)                     # folded into Q projection
    wq_h, wk_h, wv_h, wo_h = [], [], [], []
    bq_h, bk_h, bv_h, bo = [], [], [], []
    w1s, b1s, w2s, b2s = [], [], [], []
    g1s, be1s, g2s, be2s = [], [], [], []

    for i in range(layers):
        kq, kk, kv, ko, k1, k2 = keys[2 + 6 * i: 2 + 6 * (i + 1)]
        wq = lin(kq, d_model, d_model) * inv_scale      # fold 1/sqrt(head_dim)
        wk = lin(kk, d_model, d_model)
        wv = lin(kv, d_model, d_model)
        wo = lin(ko, d_model, d_model)
        # Head-major layouts: (H, D, hd) for q/k/v projections, (H, hd, D) for out.
        wq_h.append(wq.reshape(d_model, heads, hd).transpose(1, 0, 2))
        wk_h.append(wk.reshape(d_model, heads, hd).transpose(1, 0, 2))
        wv_h.append(wv.reshape(d_model, heads, hd).transpose(1, 0, 2))
        wo_h.append(wo.reshape(heads, hd, d_model))
        # Zero biases (synthetic params); bq would also carry the folded scale.
        bq_h.append(jnp.zeros((heads, 1, hd), jnp.float32))
        bk_h.append(jnp.zeros((heads, 1, hd), jnp.float32))
        bv_h.append(jnp.zeros((heads, 1, hd), jnp.float32))
        bo.append(jnp.zeros((1, d_model), jnp.float32))
        w1s.append(lin(k1, d_model, hidden_dim))
        b1s.append(jnp.zeros((1, hidden_dim), jnp.float32))
        w2s.append(lin(k2, hidden_dim, d_model))
        b2s.append(jnp.zeros((1, d_model), jnp.float32))
        g1s.append(jnp.ones((1, d_model), jnp.float32))
        be1s.append(jnp.zeros((1, d_model), jnp.float32))
        g2s.append(jnp.ones((1, d_model), jnp.float32))
        be2s.append(jnp.zeros((1, d_model), jnp.float32))

    stack = lambda xs: jnp.stack(xs, axis=0)
    bf16 = lambda a: a.astype(jnp.bfloat16)             # bf16 MXU operands, f32 accumulate

    return {
        "embed": embed,
        "wq_h": bf16(stack(wq_h)), "wk_h": bf16(stack(wk_h)), "wv_h": bf16(stack(wv_h)),
        "bq_h": stack(bq_h), "bk_h": stack(bk_h), "bv_h": stack(bv_h),
        "wo_h": bf16(stack(wo_h)), "bo": stack(bo),
        "w1": bf16(stack(w1s)), "b1": stack(b1s),
        "w2": bf16(stack(w2s)), "b2": stack(b2s),
        "g1": stack(g1s), "be1": stack(be1s), "g2": stack(g2s), "be2": stack(be2s),
        "w_out": bf16(w_out_p), "b_out": b_out_p,
    }


# ----------------------------------------------------------------------------
if __name__ == "__main__":
    # Small config consistent with the module's constructor.
    d_model, heads, n_layers, hidden_dim = 32, 4, 2, 64
    vocab_size, max_len = 64, 16
    B, L = 2, 8

    key = jax.random.PRNGKey(0)
    k_tok, k_par = jax.random.split(key)
    tokens = jax.random.randint(k_tok, (B, L), 0, vocab_size, dtype=jnp.int32)

    params = init_params(k_par, d_model, heads, n_layers, hidden_dim, vocab_size)
    pe = make_positional_encoding(d_model, max_len)

    logits = transformer_encoder_forward(tokens, params, pe, heads, vocab_size)
    jax.block_until_ready(logits)
    assert logits.shape == (B, L, vocab_size)
    print("KERNEL_OK")
</pallas_src>

<mosaic_0001>
module attributes {stable_mosaic.version = 11 : i64} {
  func.func @fused_encoder_kernel(%arg0: i32, %arg1: i32, %arg2: memref<1x8x32xf32, #tpu.memory_space<vmem>>, %arg3: memref<1x4x32x8xbf16, #tpu.memory_space<vmem>>, %arg4: memref<1x4x32x8xbf16, #tpu.memory_space<vmem>>, %arg5: memref<1x4x32x8xbf16, #tpu.memory_space<vmem>>, %arg6: memref<1x4x1x8xf32, #tpu.memory_space<vmem>>, %arg7: memref<1x4x1x8xf32, #tpu.memory_space<vmem>>, %arg8: memref<1x4x1x8xf32, #tpu.memory_space<vmem>>, %arg9: memref<1x4x8x32xbf16, #tpu.memory_space<vmem>>, %arg10: memref<1x1x32xf32, #tpu.memory_space<vmem>>, %arg11: memref<1x32x64xbf16, #tpu.memory_space<vmem>>, %arg12: memref<1x1x64xf32, #tpu.memory_space<vmem>>, %arg13: memref<1x64x32xbf16, #tpu.memory_space<vmem>>, %arg14: memref<1x1x32xf32, #tpu.memory_space<vmem>>, %arg15: memref<1x1x32xf32, #tpu.memory_space<vmem>>, %arg16: memref<1x1x32xf32, #tpu.memory_space<vmem>>, %arg17: memref<1x1x32xf32, #tpu.memory_space<vmem>>, %arg18: memref<1x1x32xf32, #tpu.memory_space<vmem>>, %arg19: memref<32x128xbf16, #tpu.memory_space<vmem>>, %arg20: memref<1x128xf32, #tpu.memory_space<vmem>>, %arg21: memref<1x8x128xf32, #tpu.memory_space<vmem>>, %arg22: memref<8x32xf32, #tpu.memory_space<vmem>>) attributes {dimension_semantics = [#tpu.dimension_semantics<parallel>, #tpu.dimension_semantics<arbitrary>], iteration_bounds = array<i64: 2, 2>, scalar_prefetch = 0 : i64, scratch_operands = 1 : i64, tpu.core_type = #tpu.core_type<tc>, window_params = [{transform_indices = @transform_0, window_bounds = array<i64: 1, 8, 32>}, {transform_indices = @transform_1, window_bounds = array<i64: 1, 4, 32, 8>}, {transform_indices = @transform_2, window_bounds = array<i64: 1, 4, 32, 8>}, {transform_indices = @transform_3, window_bounds = array<i64: 1, 4, 32, 8>}, {transform_indices = @transform_4, window_bounds = array<i64: 1, 4, 1, 8>}, {transform_indices = @transform_5, window_bounds = array<i64: 1, 4, 1, 8>}, {transform_indices = @transform_6, window_bounds = array<i64: 1, 4, 1, 8>}, {transform_indices = @transform_7, window_bounds = array<i64: 1, 4, 8, 32>}, {transform_indices = @transform_8, window_bounds = array<i64: 1, 1, 32>}, {transform_indices = @transform_9, window_bounds = array<i64: 1, 32, 64>}, {transform_indices = @transform_10, window_bounds = array<i64: 1, 1, 64>}, {transform_indices = @transform_11, window_bounds = array<i64: 1, 64, 32>}, {transform_indices = @transform_12, window_bounds = array<i64: 1, 1, 32>}, {transform_indices = @transform_13, window_bounds = array<i64: 1, 1, 32>}, {transform_indices = @transform_14, window_bounds = array<i64: 1, 1, 32>}, {transform_indices = @transform_15, window_bounds = array<i64: 1, 1, 32>}, {transform_indices = @transform_16, window_bounds = array<i64: 1, 1, 32>}, {pipeline_mode = #tpu.pipeline_mode<synchronous>, transform_indices = @transform_17, window_bounds = array<i64: 32, 128>}, {pipeline_mode = #tpu.pipeline_mode<synchronous>, transform_indices = @transform_18, window_bounds = array<i64: 1, 128>}, {transform_indices = @transform_19, window_bounds = array<i64: 1, 8, 128>}]} {
    %c0_i32 = arith.constant 0 : i32
    %0 = arith.cmpi eq, %arg1, %c0_i32 : i32
    %1 = arith.extui %0 : i1 to i32
    %c0_i32_0 = arith.constant 0 : i32
    %2 = arith.cmpi ne, %1, %c0_i32_0 : i32
    scf.if %2 {
      %c0_81 = arith.constant 0 : index
      %c0_82 = arith.constant 0 : index
      %c0_83 = arith.constant 0 : index
      %133 = vector.load %arg2[%c0_81, %c0_82, %c0_83] : memref<1x8x32xf32, #tpu.memory_space<vmem>>, vector<1x8x32xf32>
      %134 = vector.shape_cast %133 : vector<1x8x32xf32> to vector<8x32xf32>
      %c0_84 = arith.constant 0 : index
      %c0_85 = arith.constant 0 : index
      %135 = vector.load %arg22[%c0_84, %c0_85] : memref<8x32xf32, #tpu.memory_space<vmem>>, vector<8x32xf32>
      tpu.vector_store %arg22[%c0_84, %c0_85], %134 {strides = array<i32>} : memref<8x32xf32, #tpu.memory_space<vmem>>, vector<8x32xf32>,
    } else {
    }
    %c0 = arith.constant 0 : index
    %c0_1 = arith.constant 0 : index
    %3 = vector.load %arg22[%c0, %c0_1] : memref<8x32xf32, #tpu.memory_space<vmem>>, vector<8x32xf32>
    %4 = arith.truncf %3 : vector<8x32xf32> to vector<8x32xbf16>
    %5 = vector.shape_cast %4 : vector<8x32xbf16> to vector<1x8x32xbf16>
    %6 = vector.broadcast %5 : vector<1x8x32xbf16> to vector<4x8x32xbf16>
    %c0_2 = arith.constant 0 : index
    %c0_3 = arith.constant 0 : index
    %c0_4 = arith.constant 0 : index
    %c0_5 = arith.constant 0 : index
    %7 = vector.load %arg3[%c0_2, %c0_3, %c0_4, %c0_5] : memref<1x4x32x8xbf16, #tpu.memory_space<vmem>>, vector<1x4x32x8xbf16>
    %8 = vector.shape_cast %7 : vector<1x4x32x8xbf16> to vector<4x32x8xbf16>
    "tpu.trace_start"() <{level = 10 : i32, message = "hld,hdf->hlf"}> : () -> ()
    %cst = arith.constant dense<0.000000e+00> : vector<4x8x8xf32>
    %9 = tpu.matmul %6, %8, %cst {dimension_numbers = #tpu.dot_dimension_numbers<[2], [1], [1], [2], [0, 0, 0, 1, 1, 2], [0], [0]>} : vector<4x8x32xbf16>, vector<4x32x8xbf16>, vector<4x8x8xf32> -> vector<4x8x8xf32>
    "tpu.trace_stop"() : () -> ()
    %c0_6 = arith.constant 0 : index
    %c0_7 = arith.constant 0 : index
    %c0_8 = arith.constant 0 : index
    %c0_9 = arith.constant 0 : index
    %10 = vector.load %arg6[%c0_6, %c0_7, %c0_8, %c0_9] : memref<1x4x1x8xf32, #tpu.memory_space<vmem>>, vector<1x4x1x8xf32>
    %11 = vector.shape_cast %10 : vector<1x4x1x8xf32> to vector<4x1x8xf32>
    %12 = vector.broadcast %11 : vector<4x1x8xf32> to vector<4x8x8xf32>
    %13 = arith.addf %9, %12 : vector<4x8x8xf32>
    %c0_10 = arith.constant 0 : index
    %c0_11 = arith.constant 0 : index
    %c0_12 = arith.constant 0 : index
    %c0_13 = arith.constant 0 : index
    %14 = vector.load %arg4[%c0_10, %c0_11, %c0_12, %c0_13] : memref<1x4x32x8xbf16, #tpu.memory_space<vmem>>, vector<1x4x32x8xbf16>
    %15 = vector.shape_cast %14 : vector<1x4x32x8xbf16> to vector<4x32x8xbf16>
    "tpu.trace_start"() <{level = 10 : i32, message = "hld,hdf->hlf"}> : () -> ()
    %cst_14 = arith.constant dense<0.000000e+00> : vector<4x8x8xf32>
    %16 = tpu.matmul %6, %15, %cst_14 {dimension_numbers = #tpu.dot_dimension_numbers<[2], [1], [1], [2], [0, 0, 0, 1, 1, 2], [0], [0]>} : vector<4x8x32xbf16>, vector<4x32x8xbf16>, vector<4x8x8xf32> -> vector<4x8x8xf32>
    "tpu.trace_stop"() : () -> ()
    %c0_15 = arith.constant 0 : index
    %c0_16 = arith.constant 0 : index
    %c0_17 = arith.constant 0 : index
    %c0_18 = arith.constant 0 : index
    %17 = vector.load %arg7[%c0_15, %c0_16, %c0_17, %c0_18] : memref<1x4x1x8xf32, #tpu.memory_space<vmem>>, vector<1x4x1x8xf32>
    %18 = vector.shape_cast %17 : vector<1x4x1x8xf32> to vector<4x1x8xf32>
    %19 = vector.broadcast %18 : vector<4x1x8xf32> to vector<4x8x8xf32>
    %20 = arith.addf %16, %19 : vector<4x8x8xf32>
    %c0_19 = arith.constant 0 : index
    %c0_20 = arith.constant 0 : index
    %c0_21 = arith.constant 0 : index
    %c0_22 = arith.constant 0 : index
    %21 = vector.load %arg5[%c0_19, %c0_20, %c0_21, %c0_22] : memref<1x4x32x8xbf16, #tpu.memory_space<vmem>>, vector<1x4x32x8xbf16>
    %22 = vector.shape_cast %21 : vector<1x4x32x8xbf16> to vector<4x32x8xbf16>
    "tpu.trace_start"() <{level = 10 : i32, message = "hld,hdf->hlf"}> : () -> ()
    %cst_23 = arith.constant dense<0.000000e+00> : vector<4x8x8xf32>
    %23 = tpu.matmul %6, %22, %cst_23 {dimension_numbers = #tpu.dot_dimension_numbers<[2], [1], [1], [2], [0, 0, 0, 1, 1, 2], [0], [0]>} : vector<4x8x32xbf16>, vector<4x32x8xbf16>, vector<4x8x8xf32> -> vector<4x8x8xf32>
    "tpu.trace_stop"() : () -> ()
    %c0_24 = arith.constant 0 : index
    %c0_25 = arith.constant 0 : index
    %c0_26 = arith.constant 0 : index
    %c0_27 = arith.constant 0 : index
    %24 = vector.load %arg8[%c0_24, %c0_25, %c0_26, %c0_27] : memref<1x4x1x8xf32, #tpu.memory_space<vmem>>, vector<1x4x1x8xf32>
    %25 = vector.shape_cast %24 : vector<1x4x1x8xf32> to vector<4x1x8xf32>
    %26 = vector.broadcast %25 : vector<4x1x8xf32> to vector<4x8x8xf32>
    %27 = arith.addf %23, %26 : vector<4x8x8xf32>
    %28 = arith.truncf %13 : vector<4x8x8xf32> to vector<4x8x8xbf16>
    %29 = arith.truncf %20 : vector<4x8x8xf32> to vector<4x8x8xbf16>
    "tpu.trace_start"() <{level = 10 : i32, message = "hqd,hkd->hqk"}> : () -> ()
    %cst_28 = arith.constant dense<0.000000e+00> : vector<4x8x8xf32>
    %30 = tpu.matmul %28, %29, %cst_28 {dimension_numbers = #tpu.dot_dimension_numbers<[2], [2], [1], [1], [0, 0, 0, 1, 1, 1], [0], [0]>} : vector<4x8x8xbf16>, vector<4x8x8xbf16>, vector<4x8x8xf32> -> vector<4x8x8xf32>
    "tpu.trace_stop"() : () -> ()
    %cst_29 = arith.constant dense<0xFF800000> : vector<4x8xf32>
    %31 = vector.multi_reduction <maximumf>, %30, %cst_29 [2] : vector<4x8x8xf32> to vector<4x8xf32>
    %32 = vector.shape_cast %31 : vector<4x8xf32> to vector<4x8x1xf32>
    %33 = vector.broadcast %32 : vector<4x8x1xf32> to vector<4x8x8xf32>
    %34 = arith.subf %30, %33 : vector<4x8x8xf32>
    %35 = math.exp %34 : vector<4x8x8xf32>
    %cst_30 = arith.constant dense<0.000000e+00> : vector<4x8xf32>
    %36 = vector.multi_reduction <add>, %35, %cst_30 [2] : vector<4x8x8xf32> to vector<4x8xf32>
    %37 = vector.shape_cast %36 : vector<4x8xf32> to vector<4x8x1xf32>
    %38 = tpu.reciprocal %37 {approx = true} : vector<4x8x1xf32> -> vector<4x8x1xf32>
    %39 = vector.broadcast %38 : vector<4x8x1xf32> to vector<4x8x8xf32>
    %40 = arith.mulf %35, %39 : vector<4x8x8xf32>
    %41 = arith.truncf %40 : vector<4x8x8xf32> to vector<4x8x8xbf16>
    %42 = arith.truncf %27 : vector<4x8x8xf32> to vector<4x8x8xbf16>
    "tpu.trace_start"() <{level = 10 : i32, message = "hqk,hkd->hqd"}> : () -> ()
    %cst_31 = arith.constant dense<0.000000e+00> : vector<4x8x8xf32>
    %43 = tpu.matmul %41, %42, %cst_31 {dimension_numbers = #tpu.dot_dimension_numbers<[2], [1], [1], [2], [0, 0, 0, 1, 1, 2], [0], [0]>} : vector<4x8x8xbf16>, vector<4x8x8xbf16>, vector<4x8x8xf32> -> vector<4x8x8xf32>
    "tpu.trace_stop"() : () -> ()
    %44 = arith.truncf %43 : vector<4x8x8xf32> to vector<4x8x8xbf16>
    %c0_32 = arith.constant 0 : index
    %c0_33 = arith.constant 0 : index
    %c0_34 = arith.constant 0 : index
    %c0_35 = arith.constant 0 : index
    %45 = vector.load %arg9[%c0_32, %c0_33, %c0_34, %c0_35] : memref<1x4x8x32xbf16, #tpu.memory_space<vmem>>, vector<1x4x8x32xbf16>
    %46 = vector.shape_cast %45 : vector<1x4x8x32xbf16> to vector<4x8x32xbf16>
    "tpu.trace_start"() <{level = 10 : i32, message = "hld,hdf->hlf"}> : () -> ()
    %cst_36 = arith.constant dense<0.000000e+00> : vector<4x8x32xf32>
    %47 = tpu.matmul %44, %46, %cst_36 {dimension_numbers = #tpu.dot_dimension_numbers<[2], [1], [1], [2], [0, 0, 0, 1, 1, 2], [0], [0]>} : vector<4x8x8xbf16>, vector<4x8x32xbf16>, vector<4x8x32xf32> -> vector<4x8x32xf32>
    "tpu.trace_stop"() : () -> ()
    %cst_37 = arith.constant dense<0.000000e+00> : vector<8x32xf32>
    %48 = vector.multi_reduction <add>, %47, %cst_37 [0] : vector<4x8x32xf32> to vector<8x32xf32>
    %c0_38 = arith.constant 0 : index
    %c0_39 = arith.constant 0 : index
    %c0_40 = arith.constant 0 : index
    %49 = vector.load %arg10[%c0_38, %c0_39, %c0_40] : memref<1x1x32xf32, #tpu.memory_space<vmem>>, vector<1x1x32xf32>
    %50 = vector.shape_cast %49 : vector<1x1x32xf32> to vector<1x32xf32>
    %51 = vector.broadcast %50 : vector<1x32xf32> to vector<8x32xf32>
    %52 = arith.addf %48, %51 : vector<8x32xf32>
    %53 = arith.addf %3, %52 : vector<8x32xf32>
    %c0_41 = arith.constant 0 : index
    %c0_42 = arith.constant 0 : index
    %c0_43 = arith.constant 0 : index
    %54 = vector.load %arg15[%c0_41, %c0_42, %c0_43] : memref<1x1x32xf32, #tpu.memory_space<vmem>>, vector<1x1x32xf32>
    %55 = vector.shape_cast %54 : vector<1x1x32xf32> to vector<1x32xf32>
    %c0_44 = arith.constant 0 : index
    %c0_45 = arith.constant 0 : index
    %c0_46 = arith.constant 0 : index
    %56 = vector.load %arg16[%c0_44, %c0_45, %c0_46] : memref<1x1x32xf32, #tpu.memory_space<vmem>>, vector<1x1x32xf32>
    %57 = vector.shape_cast %56 : vector<1x1x32xf32> to vector<1x32xf32>
    %cst_47 = arith.constant dense<0.000000e+00> : vector<8xf32>
    %58 = vector.multi_reduction <add>, %53, %cst_47 [1] : vector<8x32xf32> to vector<8xf32>
    %59 = vector.shape_cast %58 : vector<8xf32> to vector<8x1xf32>
    %cst_48 = arith.constant 3.200000e+01 : f32
    %60 = vector.broadcast %cst_48 : f32 to vector<8x1xf32>
    %61 = arith.divf %59, %60 : vector<8x1xf32>
    %62 = vector.broadcast %61 : vector<8x1xf32> to vector<8x32xf32>
    %63 = arith.subf %53, %62 : vector<8x32xf32>
    %64 = vector.broadcast %61 : vector<8x1xf32> to vector<8x32xf32>
    %65 = arith.subf %53, %64 : vector<8x32xf32>
    %66 = arith.mulf %63, %65 : vector<8x32xf32>
    %cst_49 = arith.constant dense<0.000000e+00> : vector<8xf32>
    %67 = vector.multi_reduction <add>, %66, %cst_49 [1] : vector<8x32xf32> to vector<8xf32>
    %68 = vector.shape_cast %67 : vector<8xf32> to vector<8x1xf32>
    %cst_50 = arith.constant 3.200000e+01 : f32
    %69 = vector.broadcast %cst_50 : f32 to vector<8x1xf32>
    %70 = arith.divf %68, %69 : vector<8x1xf32>
    %71 = vector.broadcast %61 : vector<8x1xf32> to vector<8x32xf32>
    %72 = arith.subf %53, %71 : vector<8x32xf32>
    %cst_51 = arith.constant 9.99999974E-6 : f32
    %73 = vector.broadcast %cst_51 : f32 to vector<8x1xf32>
    %74 = arith.addf %70, %73 : vector<8x1xf32>
    %75 = math.rsqrt %74 : vector<8x1xf32>
    %76 = vector.broadcast %75 : vector<8x1xf32> to vector<8x32xf32>
    %77 = arith.mulf %72, %76 : vector<8x32xf32>
    %78 = vector.broadcast %55 : vector<1x32xf32> to vector<8x32xf32>
    %79 = arith.mulf %77, %78 : vector<8x32xf32>
    %80 = vector.broadcast %57 : vector<1x32xf32> to vector<8x32xf32>
    %81 = arith.addf %79, %80 : vector<8x32xf32>
    %82 = arith.truncf %81 : vector<8x32xf32> to vector<8x32xbf16>
    %c0_52 = arith.constant 0 : index
    %c0_53 = arith.constant 0 : index
    %c0_54 = arith.constant 0 : index
    %83 = vector.load %arg11[%c0_52, %c0_53, %c0_54] : memref<1x32x64xbf16, #tpu.memory_space<vmem>>, vector<1x32x64xbf16>
    %84 = vector.shape_cast %83 : vector<1x32x64xbf16> to vector<32x64xbf16>
    %cst_55 = arith.constant dense<0.000000e+00> : vector<8x64xf32>
    %85 = tpu.matmul %82, %84, %cst_55 {dimension_numbers = #tpu.dot_dimension_numbers<[1], [0], [0], [1], [0, 0, 1, 1], [], []>} : vector<8x32xbf16>, vector<32x64xbf16>, vector<8x64xf32> -> vector<8x64xf32>
    %c0_56 = arith.constant 0 : index
    %c0_57 = arith.constant 0 : index
    %c0_58 = arith.constant 0 : index
    %86 = vector.load %arg12[%c0_56, %c0_57, %c0_58] : memref<1x1x64xf32, #tpu.memory_space<vmem>>, vector<1x1x64xf32>
    %87 = vector.shape_cast %86 : vector<1x1x64xf32> to vector<1x64xf32>
    %88 = vector.broadcast %87 : vector<1x64xf32> to vector<8x64xf32>
    %89 = arith.addf %85, %88 : vector<8x64xf32>
    %cst_59 = arith.constant 0.000000e+00 : f32
    %90 = vector.broadcast %cst_59 : f32 to vector<8x64xf32>
    %91 = arith.maximumf %89, %90 : vector<8x64xf32>
    %92 = arith.truncf %91 : vector<8x64xf32> to vector<8x64xbf16>
    %c0_60 = arith.constant 0 : index
    %c0_61 = arith.constant 0 : index
    %c0_62 = arith.constant 0 : index
    %93 = vector.load %arg13[%c0_60, %c0_61, %c0_62] : memref<1x64x32xbf16, #tpu.memory_space<vmem>>, vector<1x64x32xbf16>
    %94 = vector.shape_cast %93 : vector<1x64x32xbf16> to vector<64x32xbf16>
    %cst_63 = arith.constant dense<0.000000e+00> : vector<8x32xf32>
    %95 = tpu.matmul %92, %94, %cst_63 {dimension_numbers = #tpu.dot_dimension_numbers<[1], [0], [0], [1], [0, 0, 1, 1], [], []>} : vector<8x64xbf16>, vector<64x32xbf16>, vector<8x32xf32> -> vector<8x32xf32>
    %c0_64 = arith.constant 0 : index
    %c0_65 = arith.constant 0 : index
    %c0_66 = arith.constant 0 : index
    %96 = vector.load %arg14[%c0_64, %c0_65, %c0_66] : memref<1x1x32xf32, #tpu.memory_space<vmem>>, vector<1x1x32xf32>
    %97 = vector.shape_cast %96 : vector<1x1x32xf32> to vector<1x32xf32>
    %98 = vector.broadcast %97 : vector<1x32xf32> to vector<8x32xf32>
    %99 = arith.addf %95, %98 : vector<8x32xf32>
    %100 = arith.addf %81, %99 : vector<8x32xf32>
    %c0_67 = arith.constant 0 : index
    %c0_68 = arith.constant 0 : index
    %c0_69 = arith.constant 0 : index
    %101 = vector.load %arg17[%c0_67, %c0_68, %c0_69] : memref<1x1x32xf32, #tpu.memory_space<vmem>>, vector<1x1x32xf32>
    %102 = vector.shape_cast %101 : vector<1x1x32xf32> to vector<1x32xf32>
    %c0_70 = arith.constant 0 : index
    %c0_71 = arith.constant 0 : index
    %c0_72 = arith.constant 0 : index
    %103 = vector.load %arg18[%c0_70, %c0_71, %c0_72] : memref<1x1x32xf32, #tpu.memory_space<vmem>>, vector<1x1x32xf32>
    %104 = vector.shape_cast %103 : vector<1x1x32xf32> to vector<1x32xf32>
    %cst_73 = arith.constant dense<0.000000e+00> : vector<8xf32>
    %105 = vector.multi_reduction <add>, %100, %cst_73 [1] : vector<8x32xf32> to vector<8xf32>
    %106 = vector.shape_cast %105 : vector<8xf32> to vector<8x1xf32>
    %cst_74 = arith.constant 3.200000e+01 : f32
    %107 = vector.broadcast %cst_74 : f32 to vector<8x1xf32>
    %108 = arith.divf %106, %107 : vector<8x1xf32>
    %109 = vector.broadcast %108 : vector<8x1xf32> to vector<8x32xf32>
    %110 = arith.subf %100, %109 : vector<8x32xf32>
    %111 = vector.broadcast %108 : vector<8x1xf32> to vector<8x32xf32>
    %112 = arith.subf %100, %111 : vector<8x32xf32>
    %113 = arith.mulf %110, %112 : vector<8x32xf32>
    %cst_75 = arith.constant dense<0.000000e+00> : vector<8xf32>
    %114 = vector.multi_reduction <add>, %113, %cst_75 [1] : vector<8x32xf32> to vector<8xf32>
    %115 = vector.shape_cast %114 : vector<8xf32> to vector<8x1xf32>
    %cst_76 = arith.constant 3.200000e+01 : f32
    %116 = vector.broadcast %cst_76 : f32 to vector<8x1xf32>
    %117 = arith.divf %115, %116 : vector<8x1xf32>
    %118 = vector.broadcast %108 : vector<8x1xf32> to vector<8x32xf32>
    %119 = arith.subf %100, %118 : vector<8x32xf32>
    %cst_77 = arith.constant 9.99999974E-6 : f32
    %120 = vector.broadcast %cst_77 : f32 to vector<8x1xf32>
    %121 = arith.addf %117, %120 : vector<8x1xf32>
    %122 = math.rsqrt %121 : vector<8x1xf32>
    %123 = vector.broadcast %122 : vector<8x1xf32> to vector<8x32xf32>
    %124 = arith.mulf %119, %123 : vector<8x32xf32>
    %125 = vector.broadcast %102 : vector<1x32xf32> to vector<8x32xf32>
    %126 = arith.mulf %124, %125 : vector<8x32xf32>
    %127 = vector.broadcast %104 : vector<1x32xf32> to vector<8x32xf32>
    %128 = arith.addf %126, %127 : vector<8x32xf32>
    %c0_78 = arith.constant 0 : index
    %c0_79 = arith.constant 0 : index
    %129 = vector.load %arg22[%c0_78, %c0_79] : memref<8x32xf32, #tpu.memory_space<vmem>>, vector<8x32xf32>
    tpu.vector_store %arg22[%c0_78, %c0_79], %128 {strides = array<i32>} : memref<8x32xf32, #tpu.memory_space<vmem>>, vector<8x32xf32>,
    %c1_i32 = arith.constant 1 : i32
    %130 = arith.cmpi eq, %arg1, %c1_i32 : i32
    %131 = arith.extui %130 : i1 to i32
    %c0_i32_80 = arith.constant 0 : i32
    %132 = arith.cmpi ne, %131, %c0_i32_80 : i32
    scf.if %132 {
      %133 = arith.truncf %128 : vector<8x32xf32> to vector<8x32xbf16>
      %c0_81 = arith.constant 0 : index
      %c0_82 = arith.constant 0 : index
      %134 = vector.load %arg19[%c0_81, %c0_82] : memref<32x128xbf16, #tpu.memory_space<vmem>>, vector<32x128xbf16>
      %cst_83 = arith.constant dense<0.000000e+00> : vector<8x128xf32>
      %135 = tpu.matmul %133, %134, %cst_83 {dimension_numbers = #tpu.dot_dimension_numbers<[1], [0], [0], [1], [0, 0, 1, 1], [], []>} : vector<8x32xbf16>, vector<32x128xbf16>, vector<8x128xf32> -> vector<8x128xf32>
      %c0_84 = arith.constant 0 : index
      %c0_85 = arith.constant 0 : index
      %136 = vector.load %arg20[%c0_84, %c0_85] : memref<1x128xf32, #tpu.memory_space<vmem>>, vector<1x128xf32>
      %137 = vector.broadcast %136 : vector<1x128xf32> to vector<8x128xf32>
      %138 = arith.addf %135, %137 : vector<8x128xf32>
      %c0_86 = arith.constant 0 : index
      %c0_87 = arith.constant 0 : index
      %c0_88 = arith.constant 0 : index
      %139 = vector.load %arg21[%c0_86, %c0_87, %c0_88] : memref<1x8x128xf32, #tpu.memory_space<vmem>>, vector<1x8x128xf32>
      %140 = vector.shape_cast %139 : vector<1x8x128xf32> to vector<8x128xf32>
      %141 = vector.shape_cast %138 : vector<8x128xf32> to vector<1x8x128xf32>
      tpu.vector_store %arg21[%c0_86, %c0_87, %c0_88], %141 {strides = array<i32>} : memref<1x8x128xf32, #tpu.memory_space<vmem>>, vector<1x8x128xf32>,
    } else {
    }
    return
  }
  func.func @transform_0(%arg0: i32, %arg1: i32) -> (i32, i32, i32) {
    %c0_i32 = arith.constant 0 : i32
    %c0_i32_0 = arith.constant 0 : i32
    %c0_i32_1 = arith.constant 0 : i32
    return %arg0, %c0_i32, %c0_i32_0 : i32, i32, i32
  }
  func.func @transform_1(%arg0: i32, %arg1: i32) -> (i32, i32, i32, i32) {
    %c0_i32 = arith.constant 0 : i32
    %c0_i32_0 = arith.constant 0 : i32
    %c0_i32_1 = arith.constant 0 : i32
    %c0_i32_2 = arith.constant 0 : i32
    return %arg1, %c0_i32, %c0_i32_0, %c0_i32_1 : i32, i32, i32, i32
  }
  func.func @transform_2(%arg0: i32, %arg1: i32) -> (i32, i32, i32, i32) {
    %c0_i32 = arith.constant 0 : i32
    %c0_i32_0 = arith.constant 0 : i32
    %c0_i32_1 = arith.constant 0 : i32
    %c0_i32_2 = arith.constant 0 : i32
    return %arg1, %c0_i32, %c0_i32_0, %c0_i32_1 : i32, i32, i32, i32
  }
  func.func @transform_3(%arg0: i32, %arg1: i32) -> (i32, i32, i32, i32) {
    %c0_i32 = arith.constant 0 : i32
    %c0_i32_0 = arith.constant 0 : i32
    %c0_i32_1 = arith.constant 0 : i32
    %c0_i32_2 = arith.constant 0 : i32
    return %arg1, %c0_i32, %c0_i32_0, %c0_i32_1 : i32, i32, i32, i32
  }
  func.func @transform_4(%arg0: i32, %arg1: i32) -> (i32, i32, i32, i32) {
    %c0_i32 = arith.constant 0 : i32
    %c0_i32_0 = arith.constant 0 : i32
    %c0_i32_1 = arith.constant 0 : i32
    %c0_i32_2 = arith.constant 0 : i32
    return %arg1, %c0_i32, %c0_i32_0, %c0_i32_1 : i32, i32, i32, i32
  }
  func.func @transform_5(%arg0: i32, %arg1: i32) -> (i32, i32, i32, i32) {
    %c0_i32 = arith.constant 0 : i32
    %c0_i32_0 = arith.constant 0 : i32
    %c0_i32_1 = arith.constant 0 : i32
    %c0_i32_2 = arith.constant 0 : i32
    return %arg1, %c0_i32, %c0_i32_0, %c0_i32_1 : i32, i32, i32, i32
  }
  func.func @transform_6(%arg0: i32, %arg1: i32) -> (i32, i32, i32, i32) {
    %c0_i32 = arith.constant 0 : i32
    %c0_i32_0 = arith.constant 0 : i32
    %c0_i32_1 = arith.constant 0 : i32
    %c0_i32_2 = arith.constant 0 : i32
    return %arg1, %c0_i32, %c0_i32_0, %c0_i32_1 : i32, i32, i32, i32
  }
  func.func @transform_7(%arg0: i32, %arg1: i32) -> (i32, i32, i32, i32) {
    %c0_i32 = arith.constant 0 : i32
    %c0_i32_0 = arith.constant 0 : i32
    %c0_i32_1 = arith.constant 0 : i32
    %c0_i32_2 = arith.constant 0 : i32
    return %arg1, %c0_i32, %c0_i32_0, %c0_i32_1 : i32, i32, i32, i32
  }
  func.func @transform_8(%arg0: i32, %arg1: i32) -> (i32, i32, i32) {
    %c0_i32 = arith.constant 0 : i32
    %c0_i32_0 = arith.constant 0 : i32
    %c0_i32_1 = arith.constant 0 : i32
    return %arg1, %c0_i32, %c0_i32_0 : i32, i32, i32
  }
  func.func @transform_9(%arg0: i32, %arg1: i32) -> (i32, i32, i32) {
    %c0_i32 = arith.constant 0 : i32
    %c0_i32_0 = arith.constant 0 : i32
    %c0_i32_1 = arith.constant 0 : i32
    return %arg1, %c0_i32, %c0_i32_0 : i32, i32, i32
  }
  func.func @transform_10(%arg0: i32, %arg1: i32) -> (i32, i32, i32) {
    %c0_i32 = arith.constant 0 : i32
    %c0_i32_0 = arith.constant 0 : i32
    %c0_i32_1 = arith.constant 0 : i32
    return %arg1, %c0_i32, %c0_i32_0 : i32, i32, i32
  }
  func.func @transform_11(%arg0: i32, %arg1: i32) -> (i32, i32, i32) {
    %c0_i32 = arith.constant 0 : i32
    %c0_i32_0 = arith.constant 0 : i32
    %c0_i32_1 = arith.constant 0 : i32
    return %arg1, %c0_i32, %c0_i32_0 : i32, i32, i32
  }
  func.func @transform_12(%arg0: i32, %arg1: i32) -> (i32, i32, i32) {
    %c0_i32 = arith.constant 0 : i32
    %c0_i32_0 = arith.constant 0 : i32
    %c0_i32_1 = arith.constant 0 : i32
    return %arg1, %c0_i32, %c0_i32_0 : i32, i32, i32
  }
  func.func @transform_13(%arg0: i32, %arg1: i32) -> (i32, i32, i32) {
    %c0_i32 = arith.constant 0 : i32
    %c0_i32_0 = arith.constant 0 : i32
    %c0_i32_1 = arith.constant 0 : i32
    return %arg1, %c0_i32, %c0_i32_0 : i32, i32, i32
  }
  func.func @transform_14(%arg0: i32, %arg1: i32) -> (i32, i32, i32) {
    %c0_i32 = arith.constant 0 : i32
    %c0_i32_0 = arith.constant 0 : i32
    %c0_i32_1 = arith.constant 0 : i32
    return %arg1, %c0_i32, %c0_i32_0 : i32, i32, i32
  }
  func.func @transform_15(%arg0: i32, %arg1: i32) -> (i32, i32, i32) {
    %c0_i32 = arith.constant 0 : i32
    %c0_i32_0 = arith.constant 0 : i32
    %c0_i32_1 = arith.constant 0 : i32
    return %arg1, %c0_i32, %c0_i32_0 : i32, i32, i32
  }
  func.func @transform_16(%arg0: i32, %arg1: i32) -> (i32, i32, i32) {
    %c0_i32 = arith.constant 0 : i32
    %c0_i32_0 = arith.constant 0 : i32
    %c0_i32_1 = arith.constant 0 : i32
    return %arg1, %c0_i32, %c0_i32_0 : i32, i32, i32
  }
  func.func @transform_17(%arg0: i32, %arg1: i32) -> (i32, i32) {
    %c0_i32 = arith.constant 0 : i32
    %c0_i32_0 = arith.constant 0 : i32
    %c0_i32_1 = arith.constant 0 : i32
    return %c0_i32, %c0_i32_0 : i32, i32
  }
  func.func @transform_18(%arg0: i32, %arg1: i32) -> (i32, i32) {
    %c0_i32 = arith.constant 0 : i32
    %c0_i32_0 = arith.constant 0 : i32
    %c0_i32_1 = arith.constant 0 : i32
    return %c0_i32, %c0_i32_0 : i32, i32
  }
  func.func @transform_19(%arg0: i32, %arg1: i32) -> (i32, i32, i32) {
    %c0_i32 = arith.constant 0 : i32
    %c0_i32_0 = arith.constant 0 : i32
    %c0_i32_1 = arith.constant 0 : i32
    return %arg0, %c0_i32, %c0_i32_0 : i32, i32, i32
  }
}

</mosaic_0001>

<bundles_post_ra>
// kernel: tpu_custom_call.1
= control target key start
LH: loop header
LB: loop body
LE: loop exit
PB: predicated region body
PF: predicated region fallthrough
CT: control target
= control target key end

     0   :  { %s4019_s0 = inlined_call_operand.vmem [shape: f32[2,8,32], index: 0, kind: input, shape index: {}]   ;;  %s4020_s1 = inlined_call_operand.vmem [shape: bf16[2,4,32,8], index: 1, kind: input, shape index: {}]   ;;  %s4021_s2 = inlined_call_operand.vmem [shape: bf16[2,4,32,8], index: 2, kind: input, shape index: {}]   ;;  %s4022_s3 = inlined_call_operand.vmem [shape: bf16[2,4,32,8], index: 3, kind: input, shape index: {}]   ;;  %s4023_s4 = inlined_call_operand.vmem [shape: f32[2,4,1,8], index: 4, kind: input, shape index: {}]   ;;  %s4024_s5 = inlined_call_operand.vmem [shape: f32[2,4,1,8], index: 5, kind: input, shape index: {}]   ;;  %s4025_s6 = inlined_call_operand.vmem [shape: f32[2,4,1,8], index: 6, kind: input, shape index: {}]   ;;  %s4026_s7 = inlined_call_operand.vmem [shape: bf16[2,4,8,32], index: 7, kind: input, shape index: {}]   ;;  %s4027_s8 = inlined_call_operand.vmem [shape: f32[2,1,32], index: 8, kind: input, shape index: {}]   ;;  %s4028_s9 = inlined_call_operand.vmem [shape: bf16[2,32,64], index: 9, kind: input, shape index: {}]   ;;  %s4029_s10 = inlined_call_operand.vmem [shape: f32[2,1,64], index: 10, kind: input, shape index: {}]   ;;  %s4030_s11 = inlined_call_operand.vmem [shape: bf16[2,64,32], index: 11, kind: input, shape index: {}]   ;;  %s4031_s12 = inlined_call_operand.vmem [shape: f32[2,1,32], index: 12, kind: input, shape index: {}]   ;;  %s4032_s13 = inlined_call_operand.vmem [shape: f32[2,1,32], index: 13, kind: input, shape index: {}]   ;;  %s4033_s14 = inlined_call_operand.vmem [shape: f32[2,1,32], index: 14, kind: input, shape index: {}]   ;;  %s4034_s15 = inlined_call_operand.vmem [shape: f32[2,1,32], index: 15, kind: input, shape index: {}]   ;;  %s4035_s16 = inlined_call_operand.vmem [shape: f32[2,1,32], index: 16, kind: input, shape index: {}]   ;;  %s4036_s17 = inlined_call_operand.vmem [shape: bf16[32,128], index: 17, kind: input, shape index: {}]   ;;  %s4037_s18 = inlined_call_operand.vmem [shape: f32[1,128], index: 18, kind: input, shape index: {}]   ;;  %s4038_s19 = inlined_call_operand.hbm [shape: f32[2,8,128], index: 19, kind: output, shape index: {}]  }
   0x1   :  { %4059 = sst [smem:[#allocation23_spill]] %s4019_s0 }
   0x2   :  { %4060 = sst [smem:[#allocation24_spill]] %s4020_s1 }
   0x3   :  { %4061 = sst [smem:[#allocation25_spill]] %s4021_s2 }
   0x4   :  { %4062 = sst [smem:[#allocation26_spill]] %s4022_s3 }
   0x5   :  { %4063 = sst [smem:[#allocation27_spill]] %s4023_s4 }
   0x6   :  { %4064 = sst [smem:[#allocation28_spill]] %s4024_s5 }
   0x7   :  { %4065 = sst [smem:[#allocation29_spill]] %s4025_s6 }
   0x8   :  { %4066 = sst [smem:[#allocation30_spill]] %s4026_s7 }
   0x9   :  { %4067 = sst [smem:[#allocation31_spill]] %s4028_s9 }
   0xa   :  { %4068 = sst [smem:[#allocation32_spill]] %s4031_s12 }
   0xb   :  { %4069 = sst [smem:[#allocation33_spill]] %s4035_s16 }
   0xc   :  { %4070 = sst [smem:[#allocation34_spill]] %s4036_s17 }
   0xd   :  { %4071 = sst [smem:[#allocation35_spill]] %s4037_s18 }
   0xe   :  { %4072 = sst [smem:[#allocation36_spill]] %s4038_s19 }
   0xf   :  { %24 = vsyncpa [#allocation4], 0 }
  0x10   :  { %26 = vsyncpa [#allocation4 + $0x1], 0  ;;  %s3535_s0 = smov 0   ;;  %s3537_s30 = smov 0  }
  0x11   :  { %s3539_s20 = smov 0   ;;  %s3541_s21 = smov 0  }
  0x12   :  { %s3543_s1 = smov 0   ;;  %s3545_s22 = smov 0  }
  0x13   :  { %s3547_s2 = smov 0   ;;  %s3549_s23 = smov 0  }
  0x14 LB: > { %4073 = sst [smem:[#allocation6_spill]] %s3400_s0  ;;  %s2827_s24 = sadd.s32 4294967295, %s3428_s23   ;;  %s3428_s23 = sphi %s3549_s23, %s32_s23   ;;  %s3424_s2 = sphi %s3547_s2, %s4130_s2   ;;  %s3420_s22 = sphi %s3545_s22, %s4129_s22   ;;  %s3416_s1 = sphi %s3543_s1, %s4128_s1   ;;  %s3412_s21 = sphi %s3541_s21, %s4127_s21   ;;  %s3408_s20 = sphi %s3539_s20, %s4126_s20   ;;  %s3404_s30 = sphi %s3537_s30, %s4125_s30   ;;  %s3400_s0 = sphi %s3535_s0, %s4124_s0  }
  0x15   : > { %4074 = sst [smem:[#allocation7_spill]] %s3404_s30  ;;  %s2828_s25 = sadd.s32 4294967294, %s3428_s23  }
  0x16   : > { %4075 = sst [smem:[#allocation8_spill]] %s3408_s20  ;;  %s41_s3 = sadd.s32 1, %s3420_s22 }
  0x17   : > { %4076 = sst [smem:[#allocation9_spill]] %s3412_s21  ;;  %p42_p0 = scmp.ge.s32.totalorder %s41_s3, 2 }
  0x18   : > { %4077 = sst [smem:[#allocation10_spill]] %s3416_s1  ;;  %s44_s26 = sadd.s32 1, %s3424_s2 }
  0x19   : > { %4078 = sst [smem:[#allocation11_spill]] %s3420_s22  ;;  %p545_p1 = scmp.ne.s32.totalorder %s3408_s20, %s3404_s30 }
  0x1a   : > { %4079 = sst [smem:[#allocation12_spill]] %s3424_s2  ;;  %p546_p2 = scmp.eq.s32.totalorder %s2827_s24, 3 }
  0x1b   : > { %4080 = sst [smem:[#allocation13_spill]] %s3428_s23  ;;  %s4132_s3 = smov (%p42_p0, %s41_s3), 0 }
  0x1c   : > { %4081 = sst [smem:[#allocation14_spill]] %s4132_s3  ;;  %s4134_s26 = smov (!%p42_p0, %s44_s26), %s3424_s2 }
  0x1d   : > { %p3584_p3 = por %p546_p2, %p545_p1  ;;  %p551_p4 = scmp.ne.s32.totalorder %s3404_s30, %s3400_s0 }
  0x1e   : > { %p46_p5 = scmp.ge.s32.totalorder %s4134_s26, 2  ;;  %p552_p6 = scmp.eq.s32.totalorder %s2828_s25, 3 }
  0x1f   : > { %s4082_s27 = scalar_select %p3584_p3, 1, 0 }
  0x20   : > { %p2831_p7 = scmp.ge.s32.totalorder %s3428_s23, 1  ;;  %p694_p8 = scmp.lt.s32.totalorder %s3428_s23, 5 }
  0x21   : > { %4083 = sst [smem:[#allocation15_spill]] %s4082_s27  ;;  %s4136_s26 = smov (%p46_p5, %s4134_s26), 0 }
  0x22   : > { %4084 = sst [smem:[#allocation16_spill]] %s4136_s26  ;;  %p3594_p9 = por %p552_p6, %p551_p4 }
  0x23   : > { %p695_p10 = pnand %p2831_p7, %p694_p8  ;;  %s532_s29 = ssub.s32 %s3424_s2, %s4136_s26 }
  0x24   : > { %s4085_s28 = scalar_select %p3594_p9, 1, 0 }
  0x25   : > { %s535_s24 = sadd.s32 1, %s3408_s20  ;;  %p533_p11 = scmp.eq.s32.totalorder %s532_s29, 0 }
  0x26   : > { %4086 = sst [smem:[#allocation17_spill]] %s4085_s28  ;;  %698 = sbr.rel (%p695_p10) target bundleno = 2607 (0xa2f), region = 96 }
  0x27   : > { %s3602_s3 = scalar_select %p533_p11, %s3408_s20, %s535_s24  }
  0x29   : > { %4087 = sst [smem:[#allocation18_spill]] %s3602_s3 }
  0x2d   : > { %s4047_s25 = sand.u32 1, %s3404_s30   ;;  %p812_p12 = scmp.lt.s32.totalorder %s3416_s1, 1 }
  0x2e   : > { %s3608_s22 = sshll.u32 %s4047_s25, 3  ;;  %p816_p13 = scmp.lt.s32.totalorder %s3412_s21, 1 }
  0x2f   : > { %s813_s28 = scalar_select %p812_p12, %s3416_s1, 1 }
  0x30   : > { %s3613_s0 = scalar_select %p816_p13, %s3412_s21, 1 }
  0x31   : > { %s2833_s29 = sshll.u32 %s813_s28, 3  ;;  %s4088_s2 = sld [smem:[#allocation23_spill]] }
  0x32   : > { %s2934_s20 = sshll.u32 %s3613_s0, 6  ;;  %s4089_s19 = sld [smem:[#allocation24_spill]] }
  0x33   : > { %s4090_s18 = sld [smem:[#allocation25_spill]]  ;;  %s4092_s16 = sld [smem:[#allocation26_spill]] }
  0x34   : > { %s4094_s4 = sld [smem:[#allocation27_spill]]  ;;  %s4096_s5 = sld [smem:[#allocation28_spill]] }
  0x35   : > { %s4097_s6 = sld [smem:[#allocation29_spill]]  ;;  %s4098_s7 = sld [smem:[#allocation30_spill]] }
  0x36   : > { %s4100_s9 = sld [smem:[#allocation31_spill]]  ;;  %s4102_s1 = sld [smem:[#allocation33_spill]] }
  0x37   : > { %s815_s3 = scalar_lea.vmem %s4088_s2, %s2833_s29  ;;  %s2840_s2 = sshll.u32 %s3613_s0, 2 }
  0x38   : > { %s3622_s27 = scalar_lea.vmem %s4089_s19, %s2934_s20  ;;  %s811_s12 = scalar_lea.vmem [#allocation3], %s3608_s22 }
  0x39   : > { %s3627_s17 = scalar_lea.vmem %s4090_s18, %s2934_s20  ;;  %s3632_s26 = scalar_lea.vmem %s4092_s16, %s2934_s20 }
  0x3a   : > { %4091 = sst [smem:[#allocation19_spill]] %s3627_s17  ;;  %s3638_s19 = scalar_lea.vmem %s4094_s4, %s2840_s2 }
  0x3b   : > { %4093 = sst [smem:[#allocation20_spill]] %s3632_s26  ;;  %s3643_s30 = scalar_lea.vmem %s4096_s5, %s2840_s2 }
  0x3c   : > { %4095 = sst [smem:[#allocation21_spill]] %s3638_s19  ;;  %s3648_s21 = scalar_lea.vmem %s4097_s6, %s2840_s2 }
  0x3d   : > { %s2937_s16 = sshll.u32 %s3613_s0, 4  ;;  %s2939_s18 = sshll.u32 %s3613_s0, 5 }
  0x3e   : > { %s3654_s26 = scalar_lea.vmem %s4098_s7, %s2937_s16  ;;  %s3663_s23 = scalar_lea.vmem %s4100_s9, %s2937_s16 }
  0x3f   : > { %4099 = sst [smem:[#allocation22_spill]] %s3654_s26  ;;  %s3677_s26 = scalar_lea.vmem %s4030_s11, %s2939_s18 }
  0x40   : > { %s869_s17 = scalar_lea.vmem %s4032_s13, %s3613_s0  ;;  %s872_s4 = scalar_lea.vmem %s4033_s14, %s3613_s0 }
  0x41   : > { %s875_s2 = scalar_lea.vmem %s4034_s15, %s3613_s0  ;;  %s878_s20 = scalar_lea.vmem %s4102_s1, %s3613_s0 }
  0x42   : > { %s4103_s7 = sld [smem:[#allocation9_spill]] }
  0x48   : > { %p2849_p0 = scmp.ne.s32.totalorder %s4103_s7, 0 }
  0x49   : > { %v884_v0 = vld [vmem:[%s815_s3] sm:$0xff] (!%p2849_p0)  ;;  %vm885_vm0 = vcmask (!%p2849_p0), 261120  }
  0x4a   : > { %883 = sbr.rel (%p2849_p0) target bundleno = 81 (0x51), region = 100  ;;  %886 = vst.msk [vmem:[#allocation2] sm:$0xff] (!%p2849_p0), %vm885_vm0, %v884_v0 }
  0x51 PF: > { %v3282_v1 = vld [vmem:[%s3622_s27] sm:$0xff]   ;;  %v3430_v2 = vmov 0.0   ;;  %v3283_v3 = vld [vmem:[%s3622_s27 + $0x10] sm:$0xff]   ;;  %v3284_v4 = vld [vmem:[%s3622_s27 + $0x8] sm:$0xff]   ;;  %vm3431_vm1 = vmmov 0   ;;  %vm945_vm2 = vcmask 261120   ;;  %s4108_s28 = scalar_lea.vmem %s4027_s8, %s3613_s0  ;;  %s4109_s5 = scalar_lea.vmem %s4029_s10, %s3613_s0 }
  0x52   : > { %3011 = vmatprep.subr.bf16.mxu0 %v3430_v2  ;;  %3019 = vmatprep.subr.bf16.mxu1 %v3430_v2  ;;  %v3285_v5 = vld [vmem:[%s3622_s27 + $0x18] sm:$0xff]   ;;  %v3709_v6 = vld [vmem:[#allocation2] sm:$0xff]  ;;  %s4104_s9 = sld [smem:[#allocation19_spill]]  ;;  %v3287_v9 = vld [vmem:[%s3622_s27 + $0x30] sm:$0xff]   ;;  %s4105_s3 = sld [smem:[#allocation20_spill]]  ;;  %vm1657_vm3 = vcmask 64512  }
  0x53   : > { %3012 = vmatpush3.bf16.msra.mxu0 %v3282_v1  ;;  %3015 = vmatprep.mubr.msk.bf16.mxu0 %vm3431_vm1, %v3430_v2  ;;  %v3713_v7 = vpack.c.bf16 %v3709_v6, %v3709_v6  ;;  %v3286_v8 = vld [vmem:[%s3622_s27 + $0x20] sm:$0xff]   ;;  %v3288_v10 = vld [vmem:[%s3622_s27 + $0x28] sm:$0xff]   ;;  %v3289_v11 = vld [vmem:[%s3622_s27 + $0x38] sm:$0xff]   ;;  %s4106_s27 = sld [smem:[#allocation21_spill]]  ;;  %vm1897_vm4 = vcmask 1043456   ;;  %vm2425_vm5 = vcmask 523264  }
  0x54   : > { %3020 = vmatpush3.bf16.msra.mxu1 %v3283_v3  ;;  %3013 = vmatprep.subr.bf16.mxu0 %v3430_v2  ;;  %v2866_v44 = vld [vmem:[%s3643_s30] ss:$0 sm:$0xff]  ;;  %v2867_v45 = vld [vmem:[%s3643_s30 + $0x1] ss:$0 sm:$0xff]  ;;  %v2868_v62 = vld [vmem:[%s3643_s30 + $0x2] ss:$0 sm:$0xff] }
  0x55   : > { %3021 = vmatprep.subr.bf16.mxu1 %v3430_v2  ;;  %3023 = vmatprep.mubr.msk.bf16.mxu1 %vm3431_vm1, %v3430_v2  ;;  %v2869_v0 = vld [vmem:[%s3643_s30 + $0x3] ss:$0 sm:$0xff]  ;;  %s4107_s30 = sld [smem:[#allocation22_spill]]  ;;  %s4110_s6 = sld [smem:[#allocation32_spill]] }
  0x57   : > { %3014 = vmatpush3.bf16.msra.mxu0 %v3284_v4 }
  0x58   : > { %3022 = vmatpush3.bf16.msra.mxu1 %v3285_v5  ;;  %3027 = vmatprep.subr.bf16.mxu0 %v3430_v2  ;;  %v3290_v12 = vld [vmem:[%s4104_s9] sm:$0xff]   ;;  %v3291_v13 = vld [vmem:[%s4104_s9 + $0x10] sm:$0xff]   ;;  %v3292_v14 = vld [vmem:[%s4104_s9 + $0x8] sm:$0xff]  }
  0x59   : > { %3035 = vmatprep.subr.bf16.mxu1 %v3430_v2  ;;  %v3293_v15 = vld [vmem:[%s4104_s9 + $0x18] sm:$0xff]   ;;  %v3294_v16 = vld [vmem:[%s4104_s9 + $0x20] sm:$0xff]   ;;  %v3295_v17 = vld [vmem:[%s4104_s9 + $0x30] sm:$0xff]  }
  0x5a   : > { %3016 = vmatmul.mubr.msk.bf16.vlgmr.msra.gmra.mrb[0].mxu0 %vm945_vm2, %v3713_v7  ;;  %v3296_v18 = vld [vmem:[%s4104_s9 + $0x28] sm:$0xff]   ;;  %v3297_v19 = vld [vmem:[%s4104_s9 + $0x38] sm:$0xff]   ;;  %v3298_v20 = vld [vmem:[%s4105_s3] sm:$0xff]  }
  0x5b   : > { %3024 = vmatmul.mubr.msk.bf16.vlgmr.msra.gmra.mrb[0].mxu1 %vm945_vm2, %v3713_v7  ;;  %3028 = vmatpush3.bf16.msra.mxu0 %v3286_v8  ;;  %v3299_v21 = vld [vmem:[%s4105_s3 + $0x10] sm:$0xff]   ;;  %v3300_v22 = vld [vmem:[%s4105_s3 + $0x8] sm:$0xff]   ;;  %v3301_v23 = vld [vmem:[%s4105_s3 + $0x18] sm:$0xff]   ;;  %s4111_s1 = scalar_lea.vmem %s4110_s6, %s3613_s0 }
  0x5c   : > { %3036 = vmatpush3.bf16.msra.mxu1 %v3287_v9  ;;  %3029 = vmatprep.subr.bf16.mxu0 %v3430_v2  ;;  %v3302_v24 = vld [vmem:[%s4105_s3 + $0x20] sm:$0xff]   ;;  %v3303_v25 = vld [vmem:[%s4105_s3 + $0x30] sm:$0xff]   ;;  %v3304_v26 = vld [vmem:[%s4105_s3 + $0x28] sm:$0xff]  }
  0x5d   : > { %3037 = vmatprep.subr.bf16.mxu1 %v3430_v2  ;;  %3031 = vmatprep.mubr.msk.bf16.mxu0 %vm3431_vm1, %v3430_v2  ;;  %v3305_v27 = vld [vmem:[%s4105_s3 + $0x38] sm:$0xff]   ;;  %v2850_v56 = vld [vmem:[%s4106_s27] ss:$0 sm:$0xff]  ;;  %v2851_v59 = vld [vmem:[%s4106_s27 + $0x1] ss:$0 sm:$0xff] }
  0x5e   : > { %3039 = vmatprep.mubr.msk.bf16.mxu1 %vm3431_vm1, %v3430_v2 }
  0x5f   : > { %3030 = vmatpush3.bf16.msra.mxu0 %v3288_v10 }
  0x60   : > { %3038 = vmatpush3.bf16.msra.mxu1 %v3289_v11  ;;  %3043 = vmatprep.subr.bf16.mxu0 %v3430_v2 }
  0x61   : > { %3051 = vmatprep.subr.bf16.mxu1 %v3430_v2 }
  0x62   : > { %3032 = vmatmul.mubr.msk.bf16.vlgmr.msra.gmra.mrb[4].mxu0 %vm945_vm2, %v3713_v7 }
  0x63   : > { %3040 = vmatmul.mubr.msk.bf16.vlgmr.msra.gmra.mrb[4].mxu1 %vm945_vm2, %v3713_v7  ;;  %3044 = vmatpush3.bf16.msra.mxu0 %v3290_v12 }
  0x64   : > { %3052 = vmatpush3.bf16.msra.mxu1 %v3291_v13  ;;  %3045 = vmatprep.subr.bf16.mxu0 %v3430_v2 }
  0x65   : > { %3053 = vmatprep.subr.bf16.mxu1 %v3430_v2  ;;  %3047 = vmatprep.mubr.msk.bf16.mxu0 %vm3431_vm1, %v3430_v2 }
  0x66   : > { %3055 = vmatprep.mubr.msk.bf16.mxu1 %vm3431_vm1, %v3430_v2 }
  0x67   : > { %3046 = vmatpush3.bf16.msra.mxu0 %v3292_v14 }
  0x68   : > { %3054 = vmatpush3.bf16.msra.mxu1 %v3293_v15  ;;  %3059 = vmatprep.subr.bf16.mxu0 %v3430_v2 }
  0x69   : > { %3067 = vmatprep.subr.bf16.mxu1 %v3430_v2 }
  0x6a   : > { %3048 = vmatmul.mubr.msk.bf16.vlgmr.msra.gmra.mrb[8].mxu0 %vm945_vm2, %v3713_v7 }
  0x6b   : > { %3056 = vmatmul.mubr.msk.bf16.vlgmr.msra.gmra.mrb[8].mxu1 %vm945_vm2, %v3713_v7  ;;  %3060 = vmatpush3.bf16.msra.mxu0 %v3294_v16  ;;  %v2852_v16 = vld [vmem:[%s4106_s27 + $0x2] ss:$0 sm:$0xff] }
  0x6c   : > { %3068 = vmatpush3.bf16.msra.mxu1 %v3295_v17  ;;  %3061 = vmatprep.subr.bf16.mxu0 %v3430_v2 }
  0x6d   : > { %3069 = vmatprep.subr.bf16.mxu1 %v3430_v2  ;;  %3063 = vmatprep.mubr.msk.bf16.mxu0 %vm3431_vm1, %v3430_v2 }
  0x6e   : > { %3071 = vmatprep.mubr.msk.bf16.mxu1 %vm3431_vm1, %v3430_v2 }
  0x6f   : > { %3062 = vmatpush3.bf16.msra.mxu0 %v3296_v18 }
  0x70   : > { %3070 = vmatpush3.bf16.msra.mxu1 %v3297_v19  ;;  %3075 = vmatprep.subr.bf16.mxu0 %v3430_v2  ;;  %v2853_v19 = vld [vmem:[%s4106_s27 + $0x3] ss:$0 sm:$0xff] }
  0x71   : > { %3083 = vmatprep.subr.bf16.mxu1 %v3430_v2 }
  0x72   : > { %3064 = vmatmul.mubr.msk.bf16.vlgmr.msra.gmra.mrb[12].mxu0 %vm945_vm2, %v3713_v7 }
  0x73   : > { %3072 = vmatmul.mubr.msk.bf16.vlgmr.msra.gmra.mrb[12].mxu1 %vm945_vm2, %v3713_v7  ;;  %3076 = vmatpush3.bf16.msra.mxu0 %v3298_v20 }
  0x74   : > { %3077 = vmatprep.subr.bf16.mxu0 %v3430_v2  ;;  %3079 = vmatprep.mubr.msk.bf16.mxu0 %vm3431_vm1, %v3430_v2 }
  0x75   : > { %3087 = vmatprep.mubr.msk.bf16.mxu1 %vm3431_vm1, %v3430_v2  ;;  %3084 = vmatpush3.bf16.msra.mxu1 %v3299_v21 }
  0x76   : > { %3085 = vmatprep.subr.bf16.mxu1 %v3430_v2 }
  0x77   : > { %3078 = vmatpush3.bf16.msra.mxu0 %v3300_v22 }
  0x78   : > { %3091 = vmatprep.subr.bf16.mxu0 %v3430_v2 }
  0x79   : > { %3086 = vmatpush3.bf16.msra.mxu1 %v3301_v23 }
  0x7a   : > { %3080 = vmatmul.mubr.msk.bf16.vlgmr.msra.gmra.mrb[16].mxu0 %vm945_vm2, %v3713_v7  ;;  %3099 = vmatprep.subr.bf16.mxu1 %v3430_v2 }
  0x7b   : > { %3095 = vmatprep.mubr.msk.bf16.mxu0 %vm3431_vm1, %v3430_v2  ;;  %3092 = vmatpush3.bf16.msra.mxu0 %v3302_v24 }
  0x7c   : > { %3088 = vmatmul.mubr.msk.bf16.vlgmr.msra.gmra.mrb[16].mxu1 %vm945_vm2, %v3713_v7  ;;  %3093 = vmatprep.subr.bf16.mxu0 %v3430_v2 }
  0x7d   : > { %3100 = vmatpush3.bf16.msra.mxu1 %v3303_v25  ;;  %3103 = vmatprep.mubr.msk.bf16.mxu1 %vm3431_vm1, %v3430_v2 }
  0x7e   : > { %3101 = vmatprep.subr.bf16.mxu1 %v3430_v2 }
  0x7f   : > { %3094 = vmatpush3.bf16.msra.mxu0 %v3304_v26  ;;  %v2882_v26 = vld [vmem:[%s3648_s21] ss:$0 sm:$0xff] }
  0x80   : > { %3107 = vmatprep.subr.bf16.mxu0 %v3430_v2 }
  0x81   : > { %3102 = vmatpush3.bf16.msra.mxu1 %v3305_v27 }
  0x82   : > { %3113 = vmatprep.subr.bf16.mxu1 %v3430_v2  ;;  %3096 = vmatmul.mubr.msk.bf16.vlgmr.msra.gmra.mrb[20].mxu0 %vm945_vm2, %v3713_v7 }
  0x83   : > { %3109 = vmatprep.mubr.msk.bf16.mxu0 %vm3431_vm1, %v3430_v2 }
  0x84   : > { %3104 = vmatmul.mubr.msk.bf16.vlgmr.msra.gmra.mrb[20].mxu1 %vm945_vm2, %v3713_v7 }
  0x85   : > { %3115 = vmatprep.mubr.msk.bf16.mxu1 %vm3431_vm1, %v3430_v2 }
 0x12d   : > { %v983_v28 = vpop.f32.mrb[0].mxu0 }
 0x12e   : > { %v3017_v29 = vpop.f32.mrb[1].mxu0  ;;  %v1035_v30 = vpop.f32.mrb[0].mxu1  ;;  %v984_v63 = vadd.f32 %v2850_v56, %v983_v28  ;;  %v2883_v28 = vld [vmem:[%s3648_s21 + $0x1] ss:$0 sm:$0xff] }
 0x12f   : > { %v986_v31 = vpop.f32.mrb[2].mxu0  ;;  %v3025_v32 = vpop.f32.mrb[1].mxu1  ;;  %v1036_v1 = vadd.f32 %v2851_v59, %v1035_v30 }
 0x130   : > { %v3018_v33 = vpop.f32.mrb[3].mxu0  ;;  %v1038_v34 = vpop.f32.mrb[2].mxu1  ;;  %v1649_v11 = vpack.c.bf16 %v984_v63, %v984_v63 }
 0x131   : > { %v3026_v35 = vpop.f32.mrb[3].mxu1  ;;  %v1650_v15 = vpack.c.bf16 %v1036_v1, %v1036_v1 }
 0x135   : > { %v1087_v36 = vpop.f32.mrb[4].mxu0 }
 0x136   : > { %v3033_v37 = vpop.f32.mrb[5].mxu0  ;;  %v1139_v38 = vpop.f32.mrb[4].mxu1  ;;  %v1088_v22 = vadd.f32 %v2852_v16, %v1087_v36 }
 0x137   : > { %v1090_v39 = vpop.f32.mrb[6].mxu0  ;;  %v3041_v40 = vpop.f32.mrb[5].mxu1  ;;  %v1140_v23 = vadd.f32 %v2853_v19, %v1139_v38 }
 0x138   : > { %v3034_v41 = vpop.f32.mrb[7].mxu0  ;;  %v1142_v42 = vpop.f32.mrb[6].mxu1  ;;  %v1651_v24 = vpack.c.bf16 %v1088_v22, %v1088_v22 }
 0x139   : > { %v3042_v43 = vpop.f32.mrb[7].mxu1  ;;  %v1652_v25 = vpack.c.bf16 %v1140_v23, %v1140_v23 }
 0x13d   : > { %v1235_v46 = vpop.f32.mrb[8].mxu0 }
 0x13e   : > { %v1236_v47 = vadd.f32 %v2866_v44, %v1235_v46  ;;  %v1287_v48 = vpop.f32.mrb[8].mxu1  ;;  %v3049_v49 = vpop.f32.mrb[9].mxu0 }
 0x13f   : > { %v1288_v50 = vadd.f32 %v2867_v45, %v1287_v48  ;;  %v1238_v51 = vpop.f32.mrb[10].mxu0  ;;  %v3057_v52 = vpop.f32.mrb[9].mxu1 }
 0x140   : > { %v1653_v53 = vpack.c.bf16 %v1236_v47, %v1236_v47  ;;  %v3050_v54 = vpop.f32.mrb[11].mxu0  ;;  %v1290_v55 = vpop.f32.mrb[10].mxu1 }
 0x141   : > { %v1654_v57 = vpack.c.bf16 %v1288_v50, %v1288_v50  ;;  %v3058_v58 = vpop.f32.mrb[11].mxu1 }
 0x142   : > { %v1662_v60 = vsel %vm1657_vm3, %v1653_v53, 0 }
 0x143   : > { %v1708_v61 = vsel %vm1657_vm3, %v1654_v57, 0  ;;  %3108 = vmatpush3.bf16.xpose.msra.mxu0 %v1662_v60 }
 0x144   : > { %3114 = vmatpush3.bf16.xpose.msra.mxu1 %v1708_v61  ;;  %3119 = vmatprep.subr.bf16.mxu0 %v3430_v2 }
 0x145   : > { %v1339_v3 = vpop.f32.mrb[12].mxu0  ;;  %3125 = vmatprep.subr.bf16.mxu1 %v3430_v2 }
 0x146   : > { %v1340_v4 = vadd.f32 %v2868_v62, %v1339_v3  ;;  %v1391_v5 = vpop.f32.mrb[12].mxu1  ;;  %v3065_v7 = vpop.f32.mrb[13].mxu0 }
 0x147   : > { %v1392_v8 = vadd.f32 %v2869_v0, %v1391_v5  ;;  %v1342_v9 = vpop.f32.mrb[14].mxu0  ;;  %v3073_v10 = vpop.f32.mrb[13].mxu1 }
 0x148   : > { %v1655_v12 = vpack.c.bf16 %v1340_v4, %v1340_v4  ;;  %v3066_v13 = vpop.f32.mrb[15].mxu0  ;;  %v1394_v14 = vpop.f32.mrb[14].mxu1 }
 0x149   : > { %v1656_v17 = vpack.c.bf16 %v1392_v8, %v1392_v8  ;;  %v3074_v18 = vpop.f32.mrb[15].mxu1 }
 0x14a   : > { %v1754_v20 = vsel %vm1657_vm3, %v1655_v12, 0  ;;  %3110 = vmatmul.mubr.msk.bf16.vlgmr.msra.gmra.mrb[24].mxu0 %vm1657_vm3, %v1649_v11 }
 0x14b   : > { %v1800_v21 = vsel %vm1657_vm3, %v1656_v17, 0  ;;  %3116 = vmatmul.mubr.msk.bf16.vlgmr.msra.gmra.mrb[24].mxu1 %vm1657_vm3, %v1650_v15  ;;  %3120 = vmatpush3.bf16.xpose.msra.mxu0 %v1754_v20 }
 0x14c   : > { %3126 = vmatpush3.bf16.xpose.msra.mxu1 %v1800_v21  ;;  %3121 = vmatprep.mubr.msk.bf16.mxu0 %vm3431_vm1, %v3430_v2 }
 0x14d   : > { %3127 = vmatprep.mubr.msk.bf16.mxu1 %vm3431_vm1, %v3430_v2  ;;  %3131 = vmatprep.subr.bf16.mxu0 %v3430_v2  ;;  %v1487_v27 = vpop.f32.mrb[16].mxu0 }
 0x14e   : > { %3137 = vmatprep.subr.bf16.mxu1 %v3430_v2  ;;  %v1488_v29 = vadd.f32 %v2882_v26, %v1487_v27  ;;  %v3081_v30 = vpop.f32.mrb[17].mxu0 }
 0x14f   : > { %v1490_v31 = vpop.f32.mrb[18].mxu0  ;;  %v1539_v32 = vpop.f32.mrb[16].mxu1  ;;  %v2884_v30 = vld [vmem:[%s3648_s21 + $0x2] ss:$0 sm:$0xff] }
 0x150   : > { %v1890_v33 = vpack.c.bf16 %v1488_v29, %v1488_v29  ;;  %v3082_v34 = vpop.f32.mrb[19].mxu0  ;;  %v1540_v35 = vadd.f32 %v2883_v28, %v1539_v32  ;;  %v3089_v36 = vpop.f32.mrb[17].mxu1 }
 0x151   : > { %v1542_v37 = vpop.f32.mrb[18].mxu1 }
 0x152   : > { %3122 = vmatmul.mubr.msk.bf16.vlgmr.msra.gmra.mrb[28].mxu0 %vm1657_vm3, %v1651_v24  ;;  %v1899_v38 = vsel %vm1897_vm4, %v1890_v33, 0  ;;  %v1891_v39 = vpack.c.bf16 %v1540_v35, %v1540_v35  ;;  %v3090_v40 = vpop.f32.mrb[19].mxu1  ;;  %v2885_v33 = vld [vmem:[%s3648_s21 + $0x3] ss:$0 sm:$0xff] }
 0x153   : > { %3128 = vmatmul.mubr.msk.bf16.vlgmr.msra.gmra.mrb[28].mxu1 %vm1657_vm3, %v1652_v25  ;;  %3133 = vmatprep.mubr.msk.bf16.mxu0 %vm3431_vm1, %v3430_v2 }
 0x154   : > { %3139 = vmatprep.mubr.msk.bf16.mxu1 %vm3431_vm1, %v3430_v2  ;;  %3132 = vmatpush3.bf16.msra.mxu0 %v1899_v38  ;;  %v1945_v41 = vsel %vm1897_vm4, %v1891_v39, 0 }
 0x155   : > { %3143 = vmatprep.subr.bf16.mxu0 %v3430_v2  ;;  %3138 = vmatpush3.bf16.msra.mxu1 %v1945_v41  ;;  %v3839_v42 = vpop.f32.mrb[20].mxu0 }
 0x156   : > { %3149 = vmatprep.subr.bf16.mxu1 %v3430_v2  ;;  %v3097_v44 = vpop.f32.mrb[21].mxu0  ;;  %v1592_v31 = vadd.f32 %v2884_v30, %v3839_v42 }
 0x157   : > { %v3841_v43 = vpop.f32.mrb[20].mxu1  ;;  %v1594_v46 = vpop.f32.mrb[22].mxu0 }
 0x158   : > { %v3105_v45 = vpop.f32.mrb[21].mxu1  ;;  %v3098_v48 = vpop.f32.mrb[23].mxu0  ;;  %v1892_v35 = vpack.c.bf16 %v1592_v31, %v1592_v31  ;;  %v1644_v36 = vadd.f32 %v2885_v33, %v3841_v43  ;;  %v2083_v43 = vld [vmem:[%s4107_s30] sm:$0xf] }
 0x159   : > { %v1646_v47 = vpop.f32.mrb[22].mxu1 }
 0x15a   : > { %v3106_v49 = vpop.f32.mrb[23].mxu1  ;;  %v1991_v41 = vsel %vm1897_vm4, %v1892_v35, 0  ;;  %v1893_v44 = vpack.c.bf16 %v1644_v36, %v1644_v36 }
 0x15c   : > { %v2037_v47 = vsel %vm1897_vm4, %v1893_v44, 0 }
 0x21d   : > { %v1698_v50 = vpop.f32.mrb[24].mxu0 }
 0x21e   : > { %v1744_v51 = vpop.f32.mrb[24].mxu1  ;;  %v3111_v52 = vpop.f32.mrb[25].mxu0  ;;  %v1842_v53 = vsel %vm1657_vm3, %v1698_v50, -inf }
 0x21f   : > { %v3117_v54 = vpop.f32.mrb[25].mxu1  ;;  %1843 = vmax.xlane.f32.xlu0 %v1842_v53  ;;  %v1701_v55 = vpop.f32.mrb[26].mxu0  ;;  %v1845_v59 = vsel %vm1657_vm3, %v1744_v51, -inf }
 0x220   : > { %v1747_v56 = vpop.f32.mrb[26].mxu1  ;;  %v3112_v57 = vpop.f32.mrb[27].mxu0  ;;  %v2084_v54 = vld [vmem:[%s4107_s30 + $0x4] sm:$0xf] }
 0x221   : > { %v3118_v58 = vpop.f32.mrb[27].mxu1  ;;  %v2137_v55 = vsel %vm1897_vm4, %v2084_v54, 0  ;;  %v2085_v56 = vld [vmem:[%s4107_s30 + $0x8] sm:$0xf] }
 0x223   : > { %1846 = vmax.xlane.f32.xlu0 %v1845_v59 }
 0x225   : > { %v1790_v60 = vpop.f32.mrb[28].mxu0 }
 0x226   : > { %v1836_v61 = vpop.f32.mrb[28].mxu1  ;;  %v3123_v62 = vpop.f32.mrb[29].mxu0  ;;  %v1848_v63 = vsel %vm1657_vm3, %v1790_v60, -inf }
 0x227   : > { %v3129_v0 = vpop.f32.mrb[29].mxu1  ;;  %1849 = vmax.xlane.f32.xlu1 %v1848_v63  ;;  %v1793_v1 = vpop.f32.mrb[30].mxu0  ;;  %v1851_v7 = vsel %vm1657_vm3, %v1836_v61, -inf  ;;  %v2086_v62 = vld [vmem:[%s4107_s30 + $0xc] sm:$0xf]  ;;  %s4113_s30 = sld [smem:[#allocation9_spill]] }
 0x228   : > { %v1839_v3 = vpop.f32.mrb[30].mxu1  ;;  %v3124_v4 = vpop.f32.mrb[31].mxu0 }
 0x229   : > { %v3130_v5 = vpop.f32.mrb[31].mxu1  ;;  %v2229_v4 = vsel %vm1897_vm4, %v2086_v62, 0 }
 0x22b   : > { %1852 = vmax.xlane.f32.xlu1 %v1851_v7 }
 0x22d   : > { %p2925_p1 = scmp.ne.s32.totalorder %s4113_s30, 1 }
 0x22e   : > { %vm3433_vm6 = vmmov (!%p2925_p1), 0   ;;  %s4115_s29 = sld [smem:[#allocation35_spill]] (!%p2925_p1) }
 0x2ac   : > { %v1844_v8 = vpop.xlane.xlu0 %1843 }
 0x2ad   : > { %v1854_v9 = vsub.f32 %v1698_v50, %v1844_v8  ;;  %v2091_v50 = vsel %vm1897_vm4, %v2083_v43, 0 }
 0x2af   : > { %v1858_v10 = vmul.f32 1.442695, %v1854_v9 }
 0x2b0   : > { %v1847_v11 = vpop.xlane.xlu0 %1846 }
 0x2b1   : > { %3312 = vpow2.f32 %v1858_v10  ;;  %v1855_v12 = vsub.f32 %v1744_v51, %v1847_v11 }
 0x2b3   : > { %v1860_v13 = vmul.f32 1.442695, %v1855_v12 }
 0x2b4   : > { %v1850_v14 = vpop.xlane.xlu1 %1849 }
 0x2b5   : > { %3314 = vpow2.f32 %v1860_v13  ;;  %v1856_v15 = vsub.f32 %v1790_v60, %v1850_v14  ;;  %v2183_v60 = vsel %vm1897_vm4, %v2085_v56, 0 }
 0x2b7   : > { %v1862_v16 = vmul.f32 1.442695, %v1856_v15 }
 0x2b8   : > { %v1853_v17 = vpop.xlane.xlu1 %1852 }
 0x2b9   : > { %3316 = vpow2.f32 %v1862_v16  ;;  %v1857_v18 = vsub.f32 %v1836_v61, %v1853_v17 }
 0x2bb   : > { %v3313_v19 = vpop.eup %3312  ;;  %v1864_v20 = vmul.f32 1.442695, %v1857_v18 }
 0x2bc   : > { %v1866_v21 = vsel %vm1657_vm3, %v3313_v19, 0.0 }
 0x2bd   : > { %3318 = vpow2.f32 %v1864_v20  ;;  %1867 = vadd.xlane.f32.xlu0 %v1866_v21 }
 0x2bf   : > { %v3315_v22 = vpop.eup %3314 }
 0x2c0   : > { %v1869_v23 = vsel %vm1657_vm3, %v3315_v22, 0.0 }
 0x2c1   : > { %1870 = vadd.xlane.f32.xlu1 %v1869_v23 }
 0x2c3   : > { %v3317_v24 = vpop.eup %3316 }
 0x2c4   : > { %v1872_v25 = vsel %vm1657_vm3, %v3317_v24, 0.0 }
 0x2c5   : > { %1873 = vadd.xlane.f32.xlu0 %v1872_v25 }
 0x2c7   : > { %v3319_v26 = vpop.eup %3318 }
 0x2c8   : > { %v1875_v27 = vsel %vm1657_vm3, %v3319_v26, 0.0 }
 0x2c9   : > { %1876 = vadd.xlane.f32.xlu1 %v1875_v27 }
 0x34a   : > { %v1868_v28 = vpop.xlane.xlu0 %1867 }
 0x34b   : > { %3320 = vrcp.f32 %v1868_v28 }
 0x34e   : > { %v1871_v29 = vpop.xlane.xlu1 %1870 }
 0x34f   : > { %3322 = vrcp.f32 %v1871_v29 }
 0x352   : > { %v1874_v32 = vpop.xlane.xlu0 %1873 }
 0x353   : > { %3324 = vrcp.f32 %v1874_v32 }
 0x355   : > { %v3321_v34 = vpop.eup %3320 }
 0x356   : > { %v1882_v37 = vmul.f32 %v3321_v34, %v3313_v19  ;;  %v1877_v38 = vpop.xlane.xlu1 %1876 }
 0x357   : > { %3326 = vrcp.f32 %v1877_v38 }
 0x358   : > { %v1886_v39 = vpack.c.bf16 %v1882_v37, %v1882_v37  ;;  %v2910_v37 = vld [vmem:[%s4108_s28] ss:$0 sm:$0xff]  ;;  %s4114_s28 = sld [smem:[#allocation34_spill]] (!%p2925_p1) }
 0x359   : > { %v3323_v40 = vpop.eup %3322 }
 0x35a   : > { %v1883_v45 = vmul.f32 %v3323_v40, %v3315_v22  ;;  %3134 = vmatmul.mubr.msk.bf16.vlgmr.msra.gmra.mrb[32].mxu0 %vm1657_vm3, %v1886_v39 }
 0x35b   : > { %3144 = vmatpush3.bf16.msra.mxu0 %v1991_v41  ;;  %3145 = vmatprep.mubr.msk.bf16.mxu0 %vm3431_vm1, %v3430_v2 }
 0x35c   : > { %v1887_v42 = vpack.c.bf16 %v1883_v45, %v1883_v45  ;;  %3155 = vmatprep.subr.bf16.mxu0 %v3430_v2 }
 0x35d   : > { %v3325_v46 = vpop.eup %3324 }
 0x35e   : > { %v1884_v48 = vmul.f32 %v3325_v46, %v3317_v24  ;;  %3140 = vmatmul.mubr.msk.bf16.vlgmr.msra.gmra.mrb[32].mxu1 %vm1657_vm3, %v1887_v42 }
 0x35f   : > { %3150 = vmatpush3.bf16.msra.mxu1 %v2037_v47  ;;  %3151 = vmatprep.mubr.msk.bf16.mxu1 %vm3431_vm1, %v3430_v2 }
 0x360   : > { %v1888_v49 = vpack.c.bf16 %v1884_v48, %v1884_v48  ;;  %3161 = vmatprep.subr.bf16.mxu1 %v3430_v2 }
 0x361   : > { %v3327_v51 = vpop.eup %3326 }
 0x362   : > { %v1885_v52 = vmul.f32 %v3327_v51, %v3319_v26  ;;  %3146 = vmatmul.mubr.msk.bf16.vlgmr.msra.gmra.mrb[36].mxu0 %vm1657_vm3, %v1888_v49  ;;  %v3307_v51 = vld [vmem:[%s3663_s23 + $0x8] sm:$0xff]  }
 0x363   : > { %3156 = vmatpush3.bf16.msra.mxu0 %v2091_v50  ;;  %3157 = vmatprep.mubr.msk.bf16.mxu0 %vm3431_vm1, %v3430_v2  ;;  %v3306_v50 = vld [vmem:[%s3663_s23] sm:$0xff]  }
 0x364   : > { %v1889_v53 = vpack.c.bf16 %v1885_v52, %v1885_v52  ;;  %3167 = vmatprep.subr.bf16.mxu0 %v3430_v2  ;;  %v3309_v52 = vld [vmem:[%s3677_s26 + $0x8] sm:$0xff]  }
 0x366   : > { %3152 = vmatmul.mubr.msk.bf16.vlgmr.msra.gmra.mrb[36].mxu1 %vm1657_vm3, %v1889_v53 }
 0x367   : > { %3163 = vmatprep.mubr.msk.bf16.mxu1 %vm3431_vm1, %v3430_v2  ;;  %3162 = vmatpush3.bf16.msra.mxu1 %v2137_v55 }
 0x368   : > { %3173 = vmatprep.subr.bf16.mxu1 %v3430_v2 }
 0x42d   : > { %v1935_v57 = vpop.f32.mrb[32].mxu0 }
 0x42e   : > { %v2079_v58 = vpack.c.bf16 %v1935_v57, %v1935_v57  ;;  %v3135_v59 = vpop.f32.mrb[33].mxu0  ;;  %v2911_v57 = vld [vmem:[%s869_s17] ss:$0 sm:$0xff] }
 0x42f   : > { %v1938_v61 = vpop.f32.mrb[34].mxu0  ;;  %v2912_v59 = vld [vmem:[%s872_s4] ss:$0 sm:$0xff] }
 0x430   : > { %v3136_v63 = vpop.f32.mrb[35].mxu0  ;;  %3158 = vmatmul.mubr.msk.bf16.vlgmr.msra.gmra.mrb[40].mxu0 %vm1657_vm3, %v2079_v58 }
 0x431   : > { %v1981_v0 = vpop.f32.mrb[32].mxu1  ;;  %3168 = vmatpush3.bf16.msra.mxu0 %v2183_v60  ;;  %3169 = vmatprep.mubr.msk.bf16.mxu0 %vm3431_vm1, %v3430_v2  ;;  %v3310_v63 = vld [vmem:[%s3677_s26 + $0x10] sm:$0xff]  }
 0x432   : > { %v2080_v1 = vpack.c.bf16 %v1981_v0, %v1981_v0  ;;  %v3141_v3 = vpop.f32.mrb[33].mxu1  ;;  %3179 = vmatprep.subr.bf16.mxu0 %v3430_v2  ;;  %v3311_v0 = vld [vmem:[%s3677_s26 + $0x18] sm:$0xff]  }
 0x433   : > { %v1984_v5 = vpop.f32.mrb[34].mxu1 }
 0x434   : > { %v3142_v7 = vpop.f32.mrb[35].mxu1  ;;  %3164 = vmatmul.mubr.msk.bf16.vlgmr.msra.gmra.mrb[40].mxu1 %vm1657_vm3, %v2080_v1  ;;  %v2913_v1 = vld [vmem:[%s4109_s5] ss:$0 sm:$0xff] }
 0x435   : > { %v2027_v8 = vpop.f32.mrb[36].mxu0  ;;  %3174 = vmatpush3.bf16.msra.mxu1 %v2229_v4  ;;  %3175 = vmatprep.mubr.msk.bf16.mxu1 %vm3431_vm1, %v3430_v2 }
 0x436   : > { %v2081_v9 = vpack.c.bf16 %v2027_v8, %v2027_v8  ;;  %v3147_v10 = vpop.f32.mrb[37].mxu0  ;;  %3187 = vmatprep.subr.bf16.mxu1 %v3430_v2 }
 0x437   : > { %v2030_v11 = vpop.f32.mrb[38].mxu0 }
 0x438   : > { %v3148_v12 = vpop.f32.mrb[39].mxu0  ;;  %3170 = vmatmul.mubr.msk.bf16.vlgmr.msra.gmra.mrb[44].mxu0 %vm1657_vm3, %v2081_v9 }
 0x439   : > { %v2073_v13 = vpop.f32.mrb[36].mxu1  ;;  %3183 = vmatprep.mubr.msk.bf16.mxu0 %vm3431_vm1, %v3430_v2  ;;  %3180 = vmatpush3.bf16.msra.mxu0 %v3306_v50 }
 0x43a   : > { %v2082_v14 = vpack.c.bf16 %v2073_v13, %v2073_v13  ;;  %v3153_v15 = vpop.f32.mrb[37].mxu1  ;;  %3181 = vmatprep.subr.bf16.mxu0 %v3430_v2 }
 0x43b   : > { %v2076_v16 = vpop.f32.mrb[38].mxu1 }
 0x43c   : > { %v3154_v17 = vpop.f32.mrb[39].mxu1  ;;  %3176 = vmatmul.mubr.msk.bf16.vlgmr.msra.gmra.mrb[44].mxu1 %vm1657_vm3, %v2082_v14 }
 0x43d   : > { %3195 = vmatprep.mubr.msk.bf16.mxu1 %vm3431_vm1, %v3430_v2  ;;  %3182 = vmatpush3.bf16.msra.mxu0 %v3307_v51 }
 0x503   : > { %v2127_v18 = vpop.f32.mrb[40].mxu0 }
 0x504   : > { %v3159_v19 = vpop.f32.mrb[41].mxu0  ;;  %v2271_v23 = vsel %vm945_vm2, %v2127_v18, 0.0 }
 0x505   : > { %v2130_v20 = vpop.f32.mrb[42].mxu0 }
 0x506   : > { %v3160_v21 = vpop.f32.mrb[43].mxu0 }
 0x507   : > { %v2173_v22 = vpop.f32.mrb[40].mxu1 }
 0x508   : > { %v2272_v24 = vsel %vm945_vm2, %v2173_v22, 0.0  ;;  %v3165_v25 = vpop.f32.mrb[41].mxu1 }
 0x509   : > { %v2273_v26 = vadd.f32 %v2272_v24, %v2271_v23  ;;  %v2176_v27 = vpop.f32.mrb[42].mxu1 }
 0x50a   : > { %v3166_v28 = vpop.f32.mrb[43].mxu1  ;;  %v2923_v27 = vld [vmem:[%s875_s2] ss:$0 sm:$0xff] }
 0x50b   : > { %v2219_v29 = vpop.f32.mrb[44].mxu0 }
 0x50c   : > { %v2274_v30 = vsel %vm945_vm2, %v2219_v29, 0.0  ;;  %v3171_v31 = vpop.f32.mrb[45].mxu0  ;;  %v2924_v29 = vld [vmem:[%s878_s20] ss:$0 sm:$0xff] }
 0x50d   : > { %v2275_v32 = vadd.f32 %v2274_v30, %v2273_v26  ;;  %v2222_v33 = vpop.f32.mrb[46].mxu0 }
 0x50e   : > { %v3172_v34 = vpop.f32.mrb[47].mxu0  ;;  %v3432_v33 = vmov (!%p2925_p1), 0.0  }
 0x50f   : > { %v2265_v35 = vpop.f32.mrb[44].mxu1  ;;  %3199 = vmatprep.subr.bf16.mxu0 (!%p2925_p1), %v3432_v33  ;;  %v3333_v34 = vld [vmem:[%s4114_s28 + $0x8] sm:$0xff] (!%p2925_p1)  }
 0x510   : > { %v2276_v36 = vsel %vm945_vm2, %v2265_v35, 0.0  ;;  %v3177_v38 = vpop.f32.mrb[45].mxu1 }
 0x511   : > { %v2277_v39 = vadd.f32 %v2276_v36, %v2275_v32  ;;  %v2268_v40 = vpop.f32.mrb[46].mxu1  ;;  %v3332_v32 = vld [vmem:[%s4114_s28] sm:$0xff] (!%p2925_p1)  }
 0x512   : > { %v3178_v41 = vpop.f32.mrb[47].mxu1  ;;  %v2926_v36 = vld [vmem:[%s4115_s29] ss:$0 sm:$0xff] (!%p2925_p1) }
 0x513   : > { %v2285_v44 = vadd.f32 %v2910_v37, %v2277_v39 }
 0x515   : > { %v2286_v45 = vadd.f32 %v2285_v44, %v3709_v6  ;;  %v3308_v6 = vld [vmem:[%s3677_s26] sm:$0xff]  }
 0x516   : > { %3188 = vmatpush3.bf16.msra.mxu1 %v3308_v6 }
 0x517   : > { %v2289_v42 = vsel %vm945_vm2, %v2286_v45, 0.0  ;;  %3189 = vmatprep.subr.bf16.mxu1 %v3430_v2 }
 0x518   : > { %2290 = vadd.xlane.f32.xlu0 %v2289_v42 }
 0x51a   : > { %3190 = vmatpush3.bf16.msra.mxu1 %v3309_v52 }
 0x51b   : > { %3191 = vmatprep.subr.bf16.mxu1 %v3430_v2 }
 0x51e   : > { %3192 = vmatpush3.bf16.msra.mxu1 %v3310_v63 }
 0x51f   : > { %3193 = vmatprep.subr.bf16.mxu1 %v3430_v2  ;;  %v2917_v2 = vld [vmem:[%s4111_s1] ss:$0 sm:$0xff] }
 0x522   : > { %3194 = vmatpush3.bf16.msra.mxu1 %v3311_v0 }
 0x5a5   : > { %v2291_v46 = vpop.xlane.xlu0 %2290 }
 0x5a6   : > { %v2293_v43 = vmul.f32 0.03125, %v2291_v46 }
 0x5a8   : > { %v2294_v47 = vsub.f32 %v2286_v45, %v2293_v43 }
 0x5aa   : > { %v2295_v48 = vmul.f32 %v2294_v47, %v2294_v47 }
 0x5ac   : > { %v2296_v49 = vsel %vm945_vm2, %v2295_v48, 0.0 }
 0x5ad   : > { %2297 = vadd.xlane.f32.xlu1 %v2296_v49 }
 0x63a   : > { %v2298_v53 = vpop.xlane.xlu1 %2297 }
 0x63b   : > { %v2299_v54 = vmul.f32 0.03125, %v2298_v53 }
 0x63d   : > { %v2300_v55 = vadd.f32 1e-05, %v2299_v54 }
 0x63f   : > { %3328 = vrsqrt.f32 %v2300_v55 }
 0x649   : > { %v3329_v56 = vpop.eup %3328 }
 0x64a   : > { %v2302_v58 = vmul.f32 %v3329_v56, %v2294_v47 }
 0x64c   : > { %v2309_v60 = vmul.f32 %v2911_v57, %v2302_v58 }
 0x64e   : > { %v2316_v61 = vadd.f32 %v2912_v59, %v2309_v60 }
 0x650   : > { %v2317_v62 = vpack.c.bf16 %v2316_v61, %v2316_v61 }
 0x652   : > { %3184 = vmatmul.mubr.msk.bf16.vlgmr.msra.gmra.mrb[48].mxu0 %vm945_vm2, %v2317_v62 }
 0x653   : > { %3200 = vmatpush3.bf16.msra.mxu0 (!%p2925_p1), %v3332_v32  ;;  %3203 = vmatprep.mubr.msk.bf16.mxu0 (!%p2925_p1), %vm3433_vm6, %v3432_v33 }
 0x654   : > { %3201 = vmatprep.subr.bf16.mxu0 (!%p2925_p1), %v3432_v33 }
 0x657   : > { %3202 = vmatpush3.bf16.msra.mxu0 (!%p2925_p1), %v3333_v34 }
 0x725   : > { %v2378_v3 = vpop.f32.mrb[48].mxu0 }
 0x726   : > { %v2379_v4 = vadd.f32 %v2913_v1, %v2378_v3  ;;  %v3185_v5 = vpop.f32.mrb[49].mxu0 }
 0x727   : > { %v2381_v7 = vpop.f32.mrb[50].mxu0 }
 0x728   : > { %v2384_v8 = vmax.f32 %v2379_v4, 0.0  ;;  %v3186_v9 = vpop.f32.mrb[51].mxu0 }
 0x72a   : > { %v2385_v10 = vpack.c.bf16 %v2384_v8, %v2384_v8 }
 0x72c   : > { %3196 = vmatmul.mubr.msk.bf16.vlgmr.msra.gmra.mrb[48].mxu1 %vm2425_vm5, %v2385_v10 }
 0x7ff   : > { %v2463_v11 = vpop.f32.mrb[48].mxu1 }
 0x800   : > { %v2464_v12 = vadd.f32 %v2917_v2, %v2463_v11  ;;  %v3197_v13 = vpop.f32.mrb[49].mxu1 }
 0x801   : > { %v2466_v14 = vpop.f32.mrb[50].mxu1 }
 0x802   : > { %v3198_v15 = vpop.f32.mrb[51].mxu1  ;;  %v2469_v16 = vadd.f32 %v2464_v12, %v2316_v61 }
 0x804   : > { %v2472_v17 = vsel %vm945_vm2, %v2469_v16, 0.0 }
 0x805   : > { %2473 = vadd.xlane.f32.xlu0 %v2472_v17 }
 0x892   : > { %v2474_v18 = vpop.xlane.xlu0 %2473 }
 0x893   : > { %v2475_v19 = vmul.f32 0.03125, %v2474_v18 }
 0x895   : > { %v2476_v20 = vsub.f32 %v2469_v16, %v2475_v19 }
 0x897   : > { %v2477_v21 = vmul.f32 %v2476_v20, %v2476_v20 }
 0x899   : > { %v2478_v22 = vsel %vm945_vm2, %v2477_v21, 0.0 }
 0x89a   : > { %2479 = vadd.xlane.f32.xlu1 %v2478_v22 }
 0x927   : > { %v2480_v23 = vpop.xlane.xlu1 %2479 }
 0x928   : > { %v2481_v24 = vmul.f32 0.03125, %v2480_v23 }
 0x92a   : > { %v2482_v25 = vadd.f32 1e-05, %v2481_v24 }
 0x92c   : > { %3330 = vrsqrt.f32 %v2482_v25 }
 0x936   : > { %v3331_v26 = vpop.eup %3330 }
 0x937   : > { %v2484_v28 = vmul.f32 %v3331_v26, %v2476_v20  ;;  %2503 = sbr.rel (%p2925_p1) target bundleno = 2582 (0xa16), region = 104 }
 0x939   : > { %v2491_v30 = vmul.f32 %v2923_v27, %v2484_v28 }
 0x93b   : > { %v2498_v31 = vadd.f32 %v2924_v29, %v2491_v30 }
 0x93d   : > { %2499 = vst.msk [vmem:[#allocation2] sm:$0xff] %vm945_vm2, %v2498_v31  ;;  %v2504_v35 = vpack.c.bf16 (!%p2925_p1), %v2498_v31, %v2498_v31 }
 0x93f   : > { %3204 = vmatmul.mubr.msk.bf16.vlgmr.msra.gmra.mrb[0].mxu0 %vm945_vm2, %v2504_v35 }
 0xa12   : > { %v2565_v37 = vpop.f32.mrb[0].mxu0 }
 0xa13   : > { %v2566_v38 = vadd.f32 %v2926_v36, %v2565_v37  ;;  %v3205_v39 = vpop.f32.mrb[1].mxu0 }
 0xa14   : > { %v2568_v40 = vpop.f32.mrb[2].mxu0 }
 0xa15   : > { %2571 = vst [vmem:[%s811_s12] sm:$0xff] %v2566_v38  ;;  %v3206_v41 = vpop.f32.mrb[3].mxu0 }
 0xa16 PF: > { %s4116_s24 = sld [smem:[#allocation10_spill]]  ;;  %s4117_s19 = sld [smem:[#allocation7_spill]] }
 0xa17   : > { %s4119_s25 = sld [smem:[#allocation36_spill]]  ;;  %s2586_s1 = sshll.u32 %s811_s12, 4  ;;  %s2587_s1 = int_to_ptr.vmem [resolvable:$true] %s2586_s1 }
 0xa18   : > { %s3334_s9 = scalar_lea.vmem %s2587_s1, 128  ;;  %s3434_s3 = smov [#allocation3]  }
 0xa19   : > { %p3335_p2 = scmp.ne.s32.totalorder %s2587_s1, %s3334_s9  ;;  %s3338_s27 = sshll.u32 %s3434_s3, 4  ;;  %s3339_s27 = int_to_ptr.vmem [resolvable:$false] %s3338_s27 }
 0xa1a   : > { %s3340_s30 = scalar_lea.vmem %s3339_s27, 256  ;;  %p3341_p6 = scmp.lt.s32.totalorder %s2587_s1, %s3339_s27 }
 0xa1b   : > { %p3336_p4 = pnand %p3335_p2, %p3584_p3  ;;  %p3342_p7 = scmp.lt.s32.totalorder %s3340_s30, %s3334_s9 }
 0xa1c   : > { %s2931_s17 = sshll.u32 %s4116_s24, 7  ;;  %s4120_s26 = sand.u32 1, %s4117_s19  }
 0xa1d   : > { %s3968_s6 = scalar_lea.hbm %s4119_s25, %s2931_s17  ;;  %s2573_s7 = scalar_lea.sflag [#allocation4], %s4120_s26 }
 0xa1e   : > { %p3337_p5 = pneg %p3336_p4  ;;  %p3343_p8 = por %p3342_p7, %p3341_p6 }
 0xa20   : > { %p3344_p10 = pnand %p3343_p8, %p3337_p5 }
 0xa22   : > { %3347 = shalt.err (!%p3344_p10)
}
 0xa23   : > { %s3348_s12 = scalar_lea.hbm %s3968_s6, 128  ;;  %s3352_s18 = scalar_lea.hbm %s4119_s25, 256 }
 0xa24   : > { %p3349_p11 = scmp.ne.s32.totalorder %s3968_s6, %s3348_s12  ;;  %p3353_p0 = scmp.lt.u32.totalorder %s3968_s6, %s4119_s25 }
 0xa25   : > { %p3354_p1 = scmp.lt.u32.totalorder %s3352_s18, %s3348_s12  ;;  %p3356_p4 = scmp.lt.u32.totalorder %s3348_s12, %s3968_s6 }
 0xa26   : > { %p3350_p12 = pnand %p3349_p11, %p3584_p3 }
 0xa27   : > { %p3355_p2 = por %p3354_p1, %p3353_p0 }
 0xa28   : > { %p3351_p13 = pneg %p3350_p12 }
 0xa29   : > { %p3357_p5 = por %p3356_p4, %p3355_p2 }
 0xa2b   : > { %p3358_p6 = pnand %p3357_p5, %p3351_p13 }
 0xa2d   : > { %3361 = shalt.err (!%p3358_p6)
}
 0xa2e   : > { %3207 = dma.vmem_to_hbm [thread:$0]  (%p3584_p3), %s2587_s1, 128, %s3968_s6, %s2573_s7  }
 0xa2f PF: > { %s4121_s0 = sld [smem:[#allocation13_spill]]  ;;  %s4122_s20 = sld [smem:[#allocation6_spill]] }
 0xa35   : > { %p3213_p7 = scmp.ge.s32.totalorder %s4121_s0, 2  ;;  %s2598_s24 = sand.u32 1, %s4122_s20  }
 0xa36   : > { %s2599_s19 = scalar_lea.sflag [#allocation4], %s2598_s24 }
 0xa37   : > { %p3210_p8 = pnand %p3213_p7, %p3594_p9 }
 0xa39   : > { %3395 = dma.done.wait (!%p3210_p8), %s2599_s19, 128  }
 0xa3a   : > { %3397 = vsyncadd (!%p3210_p8), %s2599_s19, 4294967168  ;;  %s32_s23 = sadd.s32 1, %s4121_s0   ;;  %s4124_s0 = sld [smem:[#allocation7_spill]] }
 0xa3b   : > { %p29_p10 = scmp.ge.s32.totalorder %s32_s23, 6   ;;  %s4125_s30 = sld [smem:[#allocation8_spill]] }
 0xa3c   : > { %s4126_s20 = sld [smem:[#allocation18_spill]]  ;;  %s4127_s21 = sld [smem:[#allocation11_spill]] }
 0xa3d   : > { %s4128_s1 = sld [smem:[#allocation12_spill]]  ;;  %s4129_s22 = sld [smem:[#allocation14_spill]] }
 0xa3e   : > { %s4130_s2 = sld [smem:[#allocation16_spill]]  ;;  %31 = sbr.rel (!%p29_p10) target bundleno = 20 (0x14), region = 187 }
 0xa45   :  { %2604 = vsyncpa [#allocation4], 1 }
 0xa46   :  { %2606 = vsyncpa [#allocation4 + $0x1], 1 }

</bundles_post_ra>
